<compile_context>
chip_gen: v5e
topology: v5e:2x2
jax: 0.10.0
libtpu: 0.0.40
codegen_flags: <defaults>
</compile_context>

<pallas_src>
import functools

import jax
import jax.numpy as jnp
import numpy as np
from jax import lax
from jax.experimental import pallas as pl
from jax.experimental.pallas import tpu as pltpu

EPS = 1e-6


# ----------------------------------------------------------------------------
# Pallas kernel: the full FTBlock forward for one batch sample, layout (C, HW).
# ----------------------------------------------------------------------------
def _ft_block_kernel(W, C, x_ref, vec_ref, mask_ref,
                     w1_ref, b1_ref, kdw_ref, b2_ref,
                     w3_ref, b3_ref, wsca_ref, bsca_ref,
                     w4_ref, b4_ref, w5_ref, b5_ref,
                     out_ref):
    x0 = x_ref[0]            # (C, HW)   f32, channels on sublanes, space on lanes
    vecs = vec_ref[0]        # (C, 8)    label-conditioned vectors (columns)
    n1w, n1b = vecs[:, 0:1], vecs[:, 1:2]
    sg1, beta = vecs[:, 2:3], vecs[:, 3:4]
    n2w, n2b = vecs[:, 4:5], vecs[:, 5:6]
    sg2, gamma = vecs[:, 6:7], vecs[:, 7:8]

    masks = mask_ref[...]    # (9, HW)   precomputed 0/1 boundary masks
    taps = kdw_ref[...]      # (2C, 9)   depthwise-conv taps (per channel)
    b2 = b2_ref[...]         # (2C, 1)

    # channel LayerNorm: channels are the sublane axis -> small sublane reduce.
    def cln(t, w, b):
        mu = jnp.mean(t, axis=0, keepdims=True)
        tc = t - mu
        var = jnp.mean(tc * tc, axis=0, keepdims=True)
        return w * (tc * lax.rsqrt(var + EPS)) + b

    # depthwise 3x3 conv (padding=1, stride=1) on the flattened spatial (lane)
    # axis: 9 taps, each a lane roll + constant boundary mask + per-channel
    # scale.  The center tap needs neither roll nor mask.
    def dwconv3x3(z):
        acc = z * taps[:, 4:5]
        t = 0
        for dh in (-1, 0, 1):
            for dw in (-1, 0, 1):
                if dh == 0 and dw == 0:
                    t += 1
                    continue
                shift = dh * W + dw
                r = jnp.roll(z, -shift, axis=1)
                acc = acc + (r * masks[t:t + 1, :]) * taps[:, t:t + 1]
                t += 1
        return acc + b2

    # ---------------- first branch ----------------
    xn = cln(x0, n1w, n1b)
    # conv1 (1x1, c -> 2c): single fused matmul, gate halves are sublane slices.
    z = jnp.dot(w1_ref[...], xn, preferred_element_type=jnp.float32) + b1_ref[...]
    # conv2: depthwise 3x3 over the full 2C activation.
    z = dwconv3x3(z)
    # CSimpleGate 1
    g = z[:C, :] * z[C:, :] * sg1
    # SCA: by linearity, Wsca @ mean_p(g) == mean_p(Wsca @ g); do the matmul on
    # the full activation (overlappable) and a cheap lane-mean afterwards.
    s = jnp.mean(jnp.dot(wsca_ref[...], g, preferred_element_type=jnp.float32),
                 axis=1, keepdims=True) + bsca_ref[...]            # (C, 1)
    g = g * s
    # conv3 (1x1, c -> c); dropout1 is identity (rate 0)
    g = jnp.dot(w3_ref[...], g, preferred_element_type=jnp.float32) + b3_ref[...]
    y = x0 + g * beta

    # ---------------- second branch (FFN) ----------------
    xn = cln(y, n2w, n2b)
    z = jnp.dot(w4_ref[...], xn, preferred_element_type=jnp.float32) + b4_ref[...]
    g = z[:C, :] * z[C:, :] * sg2
    g = jnp.dot(w5_ref[...], g, preferred_element_type=jnp.float32) + b5_ref[...]

    # lane-dense store: last dim is HW (multiple of 128 here) -> unmasked vst.
    out_ref[0] = (y + g * gamma).astype(out_ref.dtype)


# ----------------------------------------------------------------------------
# Glue: multiLinear, parameter init, wrapper around pallas_call.
# ----------------------------------------------------------------------------
def _multi_linear(plist, label):
    out = None
    for (Wl, bl), li in zip(plist, label):
        t = jnp.dot(li, Wl, precision=lax.Precision.HIGHEST) + bl
        out = t if out is None else out + t
    return out


def init_params(key, c):
    keys = iter(jax.random.split(key, 96))

    def nrm(shape, scale=0.25):
        return jax.random.normal(next(keys), shape, jnp.float32) * scale

    def ml_params():
        return [(nrm((d, c)), nrm((c,), 0.1)) for d in (1, 2, 4, 8)]

    p = {name: ml_params() for name in
         ('norm1_w', 'norm1_b', 'norm2_w', 'norm2_b',
          'sg1', 'sg2', 'beta', 'gamma')}
    p.update(
        # conv1 (c -> 2c), weights stored (out, in) for left-multiply layout
        w1=nrm((2 * c, c)), b1=nrm((2 * c, 1), 0.1),
        # conv2 depthwise 3x3: per-channel 9 taps, (2c, 9)
        kdw=nrm((2 * c, 9)), b2=nrm((2 * c, 1), 0.1),
        # conv3 (c -> c)
        w3=nrm((c, c)), b3=nrm((c, 1), 0.1),
        # SCA 1x1 conv (c -> c)
        wsca=nrm((c, c)), bsca=nrm((c, 1), 0.1),
        # conv4 (c -> 2c)
        w4=nrm((2 * c, c)), b4=nrm((2 * c, 1), 0.1),
        # conv5 (c -> c)
        w5=nrm((c, c)), b5=nrm((c, 1), 0.1),
    )
    return p


def _dwconv_masks(H, W):
    """(9, H*W) 0/1 masks: tap t=(dh+1)*3+(dw+1) valid at flat position h*W+w."""
    hh, ww = np.meshgrid(np.arange(H), np.arange(W), indexing='ij')
    rows = []
    for dh in (-1, 0, 1):
        for dw in (-1, 0, 1):
            valid = (((hh + dh) >= 0) & ((hh + dh) < H) &
                     ((ww + dw) >= 0) & ((ww + dw) < W))
            rows.append(valid.reshape(-1))
    return jnp.asarray(np.stack(rows, axis=0).astype(np.float32))


def ft_block_pallas(inp_nchw, label, params):
    N, C, H, W = inp_nchw.shape
    HW = H * W
    # NCHW -> (N, C, HW) is a pure reshape (no transpose / extra HBM pass).
    x = inp_nchw.reshape(N, C, HW).astype(jnp.float32)

    # label-conditioned per-sample vectors, packed as (N, C, 8) columns
    vecs = jnp.stack(
        [_multi_linear(params['norm1_w'], label),
         _multi_linear(params['norm1_b'], label),
         _multi_linear(params['sg1'], label),
         _multi_linear(params['beta'], label),
         _multi_linear(params['norm2_w'], label),
         _multi_linear(params['norm2_b'], label),
         _multi_linear(params['sg2'], label),
         _multi_linear(params['gamma'], label)],
        axis=2)                                                   # (N, C, 8)

    mask = _dwconv_masks(H, W)                                    # (9, HW)

    weight_names = ('w1', 'b1', 'kdw', 'b2', 'w3', 'b3',
                    'wsca', 'bsca', 'w4', 'b4', 'w5', 'b5')
    weights = [params[k] for k in weight_names]

    kern = functools.partial(_ft_block_kernel, W, C)
    out = pl.pallas_call(
        kern,
        out_shape=jax.ShapeDtypeStruct((N, C, HW), jnp.float32),
        grid_spec=pltpu.PrefetchScalarGridSpec(
            num_scalar_prefetch=0,
            grid=(N,),
            in_specs=[pl.BlockSpec((1, C, HW), lambda b: (b, 0, 0)),
                      pl.BlockSpec((1, C, 8), lambda b: (b, 0, 0)),
                      pl.BlockSpec(mask.shape, lambda b: (0, 0))]
                     + [pl.BlockSpec(w.shape, lambda b: (0, 0)) for w in weights],
            out_specs=pl.BlockSpec((1, C, HW), lambda b: (b, 0, 0)),
        ),
        compiler_params=pltpu.CompilerParams(
            dimension_semantics=("parallel",),
            vmem_limit_bytes=32 * 1024 * 1024),
    )(x, vecs, mask, *weights)

    return out.reshape(N, C, H, W)


# ----------------------------------------------------------------------------
# Pure-JAX reference (independent formulation, incl. lax depthwise conv).
# ----------------------------------------------------------------------------
def ft_block_reference(inp_nchw, label, params):
    P = lax.Precision.HIGHEST
    x = jnp.transpose(inp_nchw, (0, 2, 3, 1)).astype(jnp.float32)   # NHWC
    N, H, W, C = x.shape

    n1w, n1b = _multi_linear(params['norm1_w'], label), _multi_linear(params['norm1_b'], label)
    n2w, n2b = _multi_linear(params['norm2_w'], label), _multi_linear(params['norm2_b'], label)
    sg1, sg2 = _multi_linear(params['sg1'], label), _multi_linear(params['sg2'], label)
    beta, gamma = _multi_linear(params['beta'], label), _multi_linear(params['gamma'], label)

    def cln(t, w, b):
        mu = jnp.mean(t, axis=-1, keepdims=True)
        var = jnp.mean((t - mu) ** 2, axis=-1, keepdims=True)
        yn = (t - mu) / jnp.sqrt(var + EPS)
        return w[:, None, None, :] * yn + b[:, None, None, :]

    def conv1x1(t, Wm, bm):   # Wm: (out, in), bm: (out, 1)
        return jnp.einsum('nhwc,dc->nhwd', t, Wm, precision=P) + bm[:, 0]

    t = cln(x, n1w, n1b)
    t = conv1x1(t, params['w1'], params['b1'])
    k_hwio = jnp.transpose(params['kdw'], (1, 0)).reshape(3, 3, 1, 2 * C)
    t = lax.conv_general_dilated(
        t, k_hwio, (1, 1), 'SAME',
        dimension_numbers=('NHWC', 'HWIO', 'NHWC'),
        feature_group_count=2 * C, precision=P) + params['b2'][:, 0]
    t = t[..., :C] * t[..., C:] * sg1[:, None, None, :]
    pooled = jnp.mean(t, axis=(1, 2), keepdims=True)
    s = jnp.einsum('nijc,dc->nijd', pooled, params['wsca'], precision=P) + params['bsca'][:, 0]
    t = t * s
    t = conv1x1(t, params['w3'], params['b3'])
    y = x + t * beta[:, None, None, :]

    t = cln(y, n2w, n2b)
    t = conv1x1(t, params['w4'], params['b4'])
    t = t[..., :C] * t[..., C:] * sg2[:, None, None, :]
    t = conv1x1(t, params['w5'], params['b5'])
    out = y + t * gamma[:, None, None, :]
    return jnp.transpose(out, (0, 3, 1, 2))


# ----------------------------------------------------------------------------
if __name__ == "__main__":
    key = jax.random.PRNGKey(0)
    c = 8          # channels
    N, H, W = 2, 16, 16

    k_inp, k_lab, k_par = jax.random.split(key, 3)
    inp = jax.random.normal(k_inp, (N, c, H, W), jnp.float32)   # NCHW like PyTorch
    lab_keys = jax.random.split(k_lab, 4)
    label = [jax.random.normal(lk, (N, d), jnp.float32)
             for lk, d in zip(lab_keys, (1, 2, 4, 8))]
    params = init_params(k_par, c)

    out = jax.block_until_ready(ft_block_pallas(inp, label, params))
    ref = jax.block_until_ready(ft_block_reference(inp, label, params))
    np.testing.assert_allclose(np.asarray(out), np.asarray(ref), rtol=2e-3, atol=2e-3)
    print("KERNEL_OK")
</pallas_src>

<mosaic_0001>
module attributes {stable_mosaic.version = 11 : i64} {
  func.func @_ft_block_kernel(%arg0: i32, %arg1: memref<1x8x256xf32, #tpu.memory_space<vmem>>, %arg2: memref<1x8x8xf32, #tpu.memory_space<vmem>>, %arg3: memref<9x256xf32, #tpu.memory_space<vmem>>, %arg4: memref<16x8xf32, #tpu.memory_space<vmem>>, %arg5: memref<16x1xf32, #tpu.memory_space<vmem>>, %arg6: memref<16x9xf32, #tpu.memory_space<vmem>>, %arg7: memref<16x1xf32, #tpu.memory_space<vmem>>, %arg8: memref<8x8xf32, #tpu.memory_space<vmem>>, %arg9: memref<8x1xf32, #tpu.memory_space<vmem>>, %arg10: memref<8x8xf32, #tpu.memory_space<vmem>>, %arg11: memref<8x1xf32, #tpu.memory_space<vmem>>, %arg12: memref<16x8xf32, #tpu.memory_space<vmem>>, %arg13: memref<16x1xf32, #tpu.memory_space<vmem>>, %arg14: memref<8x8xf32, #tpu.memory_space<vmem>>, %arg15: memref<8x1xf32, #tpu.memory_space<vmem>>, %arg16: memref<1x8x256xf32, #tpu.memory_space<vmem>>) attributes {dimension_semantics = [#tpu.dimension_semantics<parallel>], iteration_bounds = array<i64: 2>, scalar_prefetch = 0 : i64, scratch_operands = 0 : i64, tpu.core_type = #tpu.core_type<tc>, window_params = [{transform_indices = @transform_0, window_bounds = array<i64: 1, 8, 256>}, {transform_indices = @transform_1, window_bounds = array<i64: 1, 8, 8>}, {pipeline_mode = #tpu.pipeline_mode<synchronous>, transform_indices = @transform_2, window_bounds = array<i64: 9, 256>}, {pipeline_mode = #tpu.pipeline_mode<synchronous>, transform_indices = @transform_3, window_bounds = array<i64: 16, 8>}, {pipeline_mode = #tpu.pipeline_mode<synchronous>, transform_indices = @transform_4, window_bounds = array<i64: 16, 1>}, {pipeline_mode = #tpu.pipeline_mode<synchronous>, transform_indices = @transform_5, window_bounds = array<i64: 16, 9>}, {pipeline_mode = #tpu.pipeline_mode<synchronous>, transform_indices = @transform_6, window_bounds = array<i64: 16, 1>}, {pipeline_mode = #tpu.pipeline_mode<synchronous>, transform_indices = @transform_7, window_bounds = array<i64: 8, 8>}, {pipeline_mode = #tpu.pipeline_mode<synchronous>, transform_indices = @transform_8, window_bounds = array<i64: 8, 1>}, {pipeline_mode = #tpu.pipeline_mode<synchronous>, transform_indices = @transform_9, window_bounds = array<i64: 8, 8>}, {pipeline_mode = #tpu.pipeline_mode<synchronous>, transform_indices = @transform_10, window_bounds = array<i64: 8, 1>}, {pipeline_mode = #tpu.pipeline_mode<synchronous>, transform_indices = @transform_11, window_bounds = array<i64: 16, 8>}, {pipeline_mode = #tpu.pipeline_mode<synchronous>, transform_indices = @transform_12, window_bounds = array<i64: 16, 1>}, {pipeline_mode = #tpu.pipeline_mode<synchronous>, transform_indices = @transform_13, window_bounds = array<i64: 8, 8>}, {pipeline_mode = #tpu.pipeline_mode<synchronous>, transform_indices = @transform_14, window_bounds = array<i64: 8, 1>}, {transform_indices = @transform_15, window_bounds = array<i64: 1, 8, 256>}]} {
    %c0 = arith.constant 0 : index
    %c0_0 = arith.constant 0 : index
    %c0_1 = arith.constant 0 : index
    %0 = vector.load %arg1[%c0, %c0_0, %c0_1] : memref<1x8x256xf32, #tpu.memory_space<vmem>>, vector<1x8x256xf32>
    %1 = vector.shape_cast %0 : vector<1x8x256xf32> to vector<8x256xf32>
    %c0_2 = arith.constant 0 : index
    %c0_3 = arith.constant 0 : index
    %c0_4 = arith.constant 0 : index
    %2 = vector.load %arg2[%c0_2, %c0_3, %c0_4] : memref<1x8x8xf32, #tpu.memory_space<vmem>>, vector<1x8x8xf32>
    %3 = vector.shape_cast %2 : vector<1x8x8xf32> to vector<8x8xf32>
    %4 = vector.extract_strided_slice %3 {offsets = [0, 0], sizes = [8, 1], strides = [1, 1]} : vector<8x8xf32> to vector<8x1xf32>
    %5 = vector.extract_strided_slice %3 {offsets = [0, 1], sizes = [8, 1], strides = [1, 1]} : vector<8x8xf32> to vector<8x1xf32>
    %6 = vector.extract_strided_slice %3 {offsets = [0, 2], sizes = [8, 1], strides = [1, 1]} : vector<8x8xf32> to vector<8x1xf32>
    %7 = vector.extract_strided_slice %3 {offsets = [0, 3], sizes = [8, 1], strides = [1, 1]} : vector<8x8xf32> to vector<8x1xf32>
    %8 = vector.extract_strided_slice %3 {offsets = [0, 4], sizes = [8, 1], strides = [1, 1]} : vector<8x8xf32> to vector<8x1xf32>
    %9 = vector.extract_strided_slice %3 {offsets = [0, 5], sizes = [8, 1], strides = [1, 1]} : vector<8x8xf32> to vector<8x1xf32>
    %10 = vector.extract_strided_slice %3 {offsets = [0, 6], sizes = [8, 1], strides = [1, 1]} : vector<8x8xf32> to vector<8x1xf32>
    %11 = vector.extract_strided_slice %3 {offsets = [0, 7], sizes = [8, 1], strides = [1, 1]} : vector<8x8xf32> to vector<8x1xf32>
    %c0_5 = arith.constant 0 : index
    %c0_6 = arith.constant 0 : index
    %12 = vector.load %arg3[%c0_5, %c0_6] : memref<9x256xf32, #tpu.memory_space<vmem>>, vector<9x256xf32>
    %c0_7 = arith.constant 0 : index
    %c0_8 = arith.constant 0 : index
    %13 = vector.load %arg6[%c0_7, %c0_8] : memref<16x9xf32, #tpu.memory_space<vmem>>, vector<16x9xf32>
    %c0_9 = arith.constant 0 : index
    %c0_10 = arith.constant 0 : index
    %14 = vector.load %arg7[%c0_9, %c0_10] : memref<16x1xf32, #tpu.memory_space<vmem>>, vector<16x1xf32>
    %cst = arith.constant dense<0.000000e+00> : vector<256xf32>
    %15 = vector.multi_reduction <add>, %1, %cst [0] : vector<8x256xf32> to vector<256xf32>
    %16 = vector.shape_cast %15 : vector<256xf32> to vector<1x256xf32>
    %cst_11 = arith.constant 8.000000e+00 : f32
    %17 = vector.broadcast %cst_11 : f32 to vector<1x256xf32>
    %18 = arith.divf %16, %17 : vector<1x256xf32>
    %19 = vector.broadcast %18 : vector<1x256xf32> to vector<8x256xf32>
    %20 = arith.subf %1, %19 : vector<8x256xf32>
    %21 = arith.mulf %20, %20 : vector<8x256xf32>
    %cst_12 = arith.constant dense<0.000000e+00> : vector<256xf32>
    %22 = vector.multi_reduction <add>, %21, %cst_12 [0] : vector<8x256xf32> to vector<256xf32>
    %23 = vector.shape_cast %22 : vector<256xf32> to vector<1x256xf32>
    %cst_13 = arith.constant 8.000000e+00 : f32
    %24 = vector.broadcast %cst_13 : f32 to vector<1x256xf32>
    %25 = arith.divf %23, %24 : vector<1x256xf32>
    %cst_14 = arith.constant 9.99999997E-7 : f32
    %26 = vector.broadcast %cst_14 : f32 to vector<1x256xf32>
    %27 = arith.addf %25, %26 : vector<1x256xf32>
    %28 = math.rsqrt %27 : vector<1x256xf32>
    %29 = vector.broadcast %28 : vector<1x256xf32> to vector<8x256xf32>
    %30 = arith.mulf %20, %29 : vector<8x256xf32>
    %31 = vector.broadcast %4 : vector<8x1xf32> to vector<8x256xf32>
    %32 = arith.mulf %31, %30 : vector<8x256xf32>
    %33 = vector.broadcast %5 : vector<8x1xf32> to vector<8x256xf32>
    %34 = arith.addf %32, %33 : vector<8x256xf32>
    %c0_15 = arith.constant 0 : index
    %c0_16 = arith.constant 0 : index
    %35 = vector.load %arg4[%c0_15, %c0_16] : memref<16x8xf32, #tpu.memory_space<vmem>>, vector<16x8xf32>
    %cst_17 = arith.constant dense<0.000000e+00> : vector<16x256xf32>
    %36 = tpu.matmul %35, %34, %cst_17 {dimension_numbers = #tpu.dot_dimension_numbers<[1], [0], [0], [1], [0, 0, 1, 1], [], []>} : vector<16x8xf32>, vector<8x256xf32>, vector<16x256xf32> -> vector<16x256xf32>
    %c0_18 = arith.constant 0 : index
    %c0_19 = arith.constant 0 : index
    %37 = vector.load %arg5[%c0_18, %c0_19] : memref<16x1xf32, #tpu.memory_space<vmem>>, vector<16x1xf32>
    %38 = vector.broadcast %37 : vector<16x1xf32> to vector<16x256xf32>
    %39 = arith.addf %36, %38 : vector<16x256xf32>
    %40 = vector.extract_strided_slice %13 {offsets = [0, 4], sizes = [16, 1], strides = [1, 1]} : vector<16x9xf32> to vector<16x1xf32>
    %41 = vector.broadcast %40 : vector<16x1xf32> to vector<16x256xf32>
    %42 = arith.mulf %39, %41 : vector<16x256xf32>
    %43 = vector.extract_strided_slice %39 {offsets = [0, 239], sizes = [16, 17], strides = [1, 1]} : vector<16x256xf32> to vector<16x17xf32>
    %44 = vector.extract_strided_slice %39 {offsets = [0, 0], sizes = [16, 239], strides = [1, 1]} : vector<16x256xf32> to vector<16x239xf32>
    %45 = tpu.concatenate %43, %44 in 1 : vector<16x17xf32>, vector<16x239xf32> -> vector<16x256xf32>
    %46 = vector.extract_strided_slice %12 {offsets = [0, 0], sizes = [1, 256], strides = [1, 1]} : vector<9x256xf32> to vector<1x256xf32>
    %47 = vector.broadcast %46 : vector<1x256xf32> to vector<16x256xf32>
    %48 = arith.mulf %45, %47 : vector<16x256xf32>
    %49 = vector.extract_strided_slice %13 {offsets = [0, 0], sizes = [16, 1], strides = [1, 1]} : vector<16x9xf32> to vector<16x1xf32>
    %50 = vector.broadcast %49 : vector<16x1xf32> to vector<16x256xf32>
    %51 = arith.mulf %48, %50 : vector<16x256xf32>
    %52 = arith.addf %42, %51 : vector<16x256xf32>
    %53 = vector.extract_strided_slice %39 {offsets = [0, 240], sizes = [16, 16], strides = [1, 1]} : vector<16x256xf32> to vector<16x16xf32>
    %54 = vector.extract_strided_slice %39 {offsets = [0, 0], sizes = [16, 240], strides = [1, 1]} : vector<16x256xf32> to vector<16x240xf32>
    %55 = tpu.concatenate %53, %54 in 1 : vector<16x16xf32>, vector<16x240xf32> -> vector<16x256xf32>
    %56 = vector.extract_strided_slice %12 {offsets = [1, 0], sizes = [1, 256], strides = [1, 1]} : vector<9x256xf32> to vector<1x256xf32>
    %57 = vector.broadcast %56 : vector<1x256xf32> to vector<16x256xf32>
    %58 = arith.mulf %55, %57 : vector<16x256xf32>
    %59 = vector.extract_strided_slice %13 {offsets = [0, 1], sizes = [16, 1], strides = [1, 1]} : vector<16x9xf32> to vector<16x1xf32>
    %60 = vector.broadcast %59 : vector<16x1xf32> to vector<16x256xf32>
    %61 = arith.mulf %58, %60 : vector<16x256xf32>
    %62 = arith.addf %52, %61 : vector<16x256xf32>
    %63 = vector.extract_strided_slice %39 {offsets = [0, 241], sizes = [16, 15], strides = [1, 1]} : vector<16x256xf32> to vector<16x15xf32>
    %64 = vector.extract_strided_slice %39 {offsets = [0, 0], sizes = [16, 241], strides = [1, 1]} : vector<16x256xf32> to vector<16x241xf32>
    %65 = tpu.concatenate %63, %64 in 1 : vector<16x15xf32>, vector<16x241xf32> -> vector<16x256xf32>
    %66 = vector.extract_strided_slice %12 {offsets = [2, 0], sizes = [1, 256], strides = [1, 1]} : vector<9x256xf32> to vector<1x256xf32>
    %67 = vector.broadcast %66 : vector<1x256xf32> to vector<16x256xf32>
    %68 = arith.mulf %65, %67 : vector<16x256xf32>
    %69 = vector.extract_strided_slice %13 {offsets = [0, 2], sizes = [16, 1], strides = [1, 1]} : vector<16x9xf32> to vector<16x1xf32>
    %70 = vector.broadcast %69 : vector<16x1xf32> to vector<16x256xf32>
    %71 = arith.mulf %68, %70 : vector<16x256xf32>
    %72 = arith.addf %62, %71 : vector<16x256xf32>
    %73 = vector.extract_strided_slice %39 {offsets = [0, 255], sizes = [16, 1], strides = [1, 1]} : vector<16x256xf32> to vector<16x1xf32>
    %74 = vector.extract_strided_slice %39 {offsets = [0, 0], sizes = [16, 255], strides = [1, 1]} : vector<16x256xf32> to vector<16x255xf32>
    %75 = tpu.concatenate %73, %74 in 1 : vector<16x1xf32>, vector<16x255xf32> -> vector<16x256xf32>
    %76 = vector.extract_strided_slice %12 {offsets = [3, 0], sizes = [1, 256], strides = [1, 1]} : vector<9x256xf32> to vector<1x256xf32>
    %77 = vector.broadcast %76 : vector<1x256xf32> to vector<16x256xf32>
    %78 = arith.mulf %75, %77 : vector<16x256xf32>
    %79 = vector.extract_strided_slice %13 {offsets = [0, 3], sizes = [16, 1], strides = [1, 1]} : vector<16x9xf32> to vector<16x1xf32>
    %80 = vector.broadcast %79 : vector<16x1xf32> to vector<16x256xf32>
    %81 = arith.mulf %78, %80 : vector<16x256xf32>
    %82 = arith.addf %72, %81 : vector<16x256xf32>
    %83 = vector.extract_strided_slice %39 {offsets = [0, 1], sizes = [16, 255], strides = [1, 1]} : vector<16x256xf32> to vector<16x255xf32>
    %84 = vector.extract_strided_slice %39 {offsets = [0, 0], sizes = [16, 1], strides = [1, 1]} : vector<16x256xf32> to vector<16x1xf32>
    %85 = tpu.concatenate %83, %84 in 1 : vector<16x255xf32>, vector<16x1xf32> -> vector<16x256xf32>
    %86 = vector.extract_strided_slice %12 {offsets = [5, 0], sizes = [1, 256], strides = [1, 1]} : vector<9x256xf32> to vector<1x256xf32>
    %87 = vector.broadcast %86 : vector<1x256xf32> to vector<16x256xf32>
    %88 = arith.mulf %85, %87 : vector<16x256xf32>
    %89 = vector.extract_strided_slice %13 {offsets = [0, 5], sizes = [16, 1], strides = [1, 1]} : vector<16x9xf32> to vector<16x1xf32>
    %90 = vector.broadcast %89 : vector<16x1xf32> to vector<16x256xf32>
    %91 = arith.mulf %88, %90 : vector<16x256xf32>
    %92 = arith.addf %82, %91 : vector<16x256xf32>
    %93 = vector.extract_strided_slice %39 {offsets = [0, 15], sizes = [16, 241], strides = [1, 1]} : vector<16x256xf32> to vector<16x241xf32>
    %94 = vector.extract_strided_slice %39 {offsets = [0, 0], sizes = [16, 15], strides = [1, 1]} : vector<16x256xf32> to vector<16x15xf32>
    %95 = tpu.concatenate %93, %94 in 1 : vector<16x241xf32>, vector<16x15xf32> -> vector<16x256xf32>
    %96 = vector.extract_strided_slice %12 {offsets = [6, 0], sizes = [1, 256], strides = [1, 1]} : vector<9x256xf32> to vector<1x256xf32>
    %97 = vector.broadcast %96 : vector<1x256xf32> to vector<16x256xf32>
    %98 = arith.mulf %95, %97 : vector<16x256xf32>
    %99 = vector.extract_strided_slice %13 {offsets = [0, 6], sizes = [16, 1], strides = [1, 1]} : vector<16x9xf32> to vector<16x1xf32>
    %100 = vector.broadcast %99 : vector<16x1xf32> to vector<16x256xf32>
    %101 = arith.mulf %98, %100 : vector<16x256xf32>
    %102 = arith.addf %92, %101 : vector<16x256xf32>
    %103 = vector.extract_strided_slice %39 {offsets = [0, 16], sizes = [16, 240], strides = [1, 1]} : vector<16x256xf32> to vector<16x240xf32>
    %104 = vector.extract_strided_slice %39 {offsets = [0, 0], sizes = [16, 16], strides = [1, 1]} : vector<16x256xf32> to vector<16x16xf32>
    %105 = tpu.concatenate %103, %104 in 1 : vector<16x240xf32>, vector<16x16xf32> -> vector<16x256xf32>
    %106 = vector.extract_strided_slice %12 {offsets = [7, 0], sizes = [1, 256], strides = [1, 1]} : vector<9x256xf32> to vector<1x256xf32>
    %107 = vector.broadcast %106 : vector<1x256xf32> to vector<16x256xf32>
    %108 = arith.mulf %105, %107 : vector<16x256xf32>
    %109 = vector.extract_strided_slice %13 {offsets = [0, 7], sizes = [16, 1], strides = [1, 1]} : vector<16x9xf32> to vector<16x1xf32>
    %110 = vector.broadcast %109 : vector<16x1xf32> to vector<16x256xf32>
    %111 = arith.mulf %108, %110 : vector<16x256xf32>
    %112 = arith.addf %102, %111 : vector<16x256xf32>
    %113 = vector.extract_strided_slice %39 {offsets = [0, 17], sizes = [16, 239], strides = [1, 1]} : vector<16x256xf32> to vector<16x239xf32>
    %114 = vector.extract_strided_slice %39 {offsets = [0, 0], sizes = [16, 17], strides = [1, 1]} : vector<16x256xf32> to vector<16x17xf32>
    %115 = tpu.concatenate %113, %114 in 1 : vector<16x239xf32>, vector<16x17xf32> -> vector<16x256xf32>
    %116 = vector.extract_strided_slice %12 {offsets = [8, 0], sizes = [1, 256], strides = [1, 1]} : vector<9x256xf32> to vector<1x256xf32>
    %117 = vector.broadcast %116 : vector<1x256xf32> to vector<16x256xf32>
    %118 = arith.mulf %115, %117 : vector<16x256xf32>
    %119 = vector.extract_strided_slice %13 {offsets = [0, 8], sizes = [16, 1], strides = [1, 1]} : vector<16x9xf32> to vector<16x1xf32>
    %120 = vector.broadcast %119 : vector<16x1xf32> to vector<16x256xf32>
    %121 = arith.mulf %118, %120 : vector<16x256xf32>
    %122 = arith.addf %112, %121 : vector<16x256xf32>
    %123 = vector.broadcast %14 : vector<16x1xf32> to vector<16x256xf32>
    %124 = arith.addf %122, %123 : vector<16x256xf32>
    %125 = vector.extract_strided_slice %124 {offsets = [0, 0], sizes = [8, 256], strides = [1, 1]} : vector<16x256xf32> to vector<8x256xf32>
    %126 = vector.extract_strided_slice %124 {offsets = [8, 0], sizes = [8, 256], strides = [1, 1]} : vector<16x256xf32> to vector<8x256xf32>
    %127 = arith.mulf %125, %126 : vector<8x256xf32>
    %128 = vector.broadcast %6 : vector<8x1xf32> to vector<8x256xf32>
    %129 = arith.mulf %127, %128 : vector<8x256xf32>
    %c0_20 = arith.constant 0 : index
    %c0_21 = arith.constant 0 : index
    %130 = vector.load %arg10[%c0_20, %c0_21] : memref<8x8xf32, #tpu.memory_space<vmem>>, vector<8x8xf32>
    %cst_22 = arith.constant dense<0.000000e+00> : vector<8x256xf32>
    %131 = tpu.matmul %130, %129, %cst_22 {dimension_numbers = #tpu.dot_dimension_numbers<[1], [0], [0], [1], [0, 0, 1, 1], [], []>} : vector<8x8xf32>, vector<8x256xf32>, vector<8x256xf32> -> vector<8x256xf32>
    %cst_23 = arith.constant dense<0.000000e+00> : vector<8xf32>
    %132 = vector.multi_reduction <add>, %131, %cst_23 [1] : vector<8x256xf32> to vector<8xf32>
    %133 = vector.shape_cast %132 : vector<8xf32> to vector<8x1xf32>
    %cst_24 = arith.constant 2.560000e+02 : f32
    %134 = vector.broadcast %cst_24 : f32 to vector<8x1xf32>
    %135 = arith.divf %133, %134 : vector<8x1xf32>
    %c0_25 = arith.constant 0 : index
    %c0_26 = arith.constant 0 : index
    %136 = vector.load %arg11[%c0_25, %c0_26] : memref<8x1xf32, #tpu.memory_space<vmem>>, vector<8x1xf32>
    %137 = arith.addf %135, %136 : vector<8x1xf32>
    %138 = vector.broadcast %137 : vector<8x1xf32> to vector<8x256xf32>
    %139 = arith.mulf %129, %138 : vector<8x256xf32>
    %c0_27 = arith.constant 0 : index
    %c0_28 = arith.constant 0 : index
    %140 = vector.load %arg8[%c0_27, %c0_28] : memref<8x8xf32, #tpu.memory_space<vmem>>, vector<8x8xf32>
    %cst_29 = arith.constant dense<0.000000e+00> : vector<8x256xf32>
    %141 = tpu.matmul %140, %139, %cst_29 {dimension_numbers = #tpu.dot_dimension_numbers<[1], [0], [0], [1], [0, 0, 1, 1], [], []>} : vector<8x8xf32>, vector<8x256xf32>, vector<8x256xf32> -> vector<8x256xf32>
    %c0_30 = arith.constant 0 : index
    %c0_31 = arith.constant 0 : index
    %142 = vector.load %arg9[%c0_30, %c0_31] : memref<8x1xf32, #tpu.memory_space<vmem>>, vector<8x1xf32>
    %143 = vector.broadcast %142 : vector<8x1xf32> to vector<8x256xf32>
    %144 = arith.addf %141, %143 : vector<8x256xf32>
    %145 = vector.broadcast %7 : vector<8x1xf32> to vector<8x256xf32>
    %146 = arith.mulf %144, %145 : vector<8x256xf32>
    %147 = arith.addf %1, %146 : vector<8x256xf32>
    %cst_32 = arith.constant dense<0.000000e+00> : vector<256xf32>
    %148 = vector.multi_reduction <add>, %147, %cst_32 [0] : vector<8x256xf32> to vector<256xf32>
    %149 = vector.shape_cast %148 : vector<256xf32> to vector<1x256xf32>
    %cst_33 = arith.constant 8.000000e+00 : f32
    %150 = vector.broadcast %cst_33 : f32 to vector<1x256xf32>
    %151 = arith.divf %149, %150 : vector<1x256xf32>
    %152 = vector.broadcast %151 : vector<1x256xf32> to vector<8x256xf32>
    %153 = arith.subf %147, %152 : vector<8x256xf32>
    %154 = arith.mulf %153, %153 : vector<8x256xf32>
    %cst_34 = arith.constant dense<0.000000e+00> : vector<256xf32>
    %155 = vector.multi_reduction <add>, %154, %cst_34 [0] : vector<8x256xf32> to vector<256xf32>
    %156 = vector.shape_cast %155 : vector<256xf32> to vector<1x256xf32>
    %cst_35 = arith.constant 8.000000e+00 : f32
    %157 = vector.broadcast %cst_35 : f32 to vector<1x256xf32>
    %158 = arith.divf %156, %157 : vector<1x256xf32>
    %cst_36 = arith.constant 9.99999997E-7 : f32
    %159 = vector.broadcast %cst_36 : f32 to vector<1x256xf32>
    %160 = arith.addf %158, %159 : vector<1x256xf32>
    %161 = math.rsqrt %160 : vector<1x256xf32>
    %162 = vector.broadcast %161 : vector<1x256xf32> to vector<8x256xf32>
    %163 = arith.mulf %153, %162 : vector<8x256xf32>
    %164 = vector.broadcast %8 : vector<8x1xf32> to vector<8x256xf32>
    %165 = arith.mulf %164, %163 : vector<8x256xf32>
    %166 = vector.broadcast %9 : vector<8x1xf32> to vector<8x256xf32>
    %167 = arith.addf %165, %166 : vector<8x256xf32>
    %c0_37 = arith.constant 0 : index
    %c0_38 = arith.constant 0 : index
    %168 = vector.load %arg12[%c0_37, %c0_38] : memref<16x8xf32, #tpu.memory_space<vmem>>, vector<16x8xf32>
    %cst_39 = arith.constant dense<0.000000e+00> : vector<16x256xf32>
    %169 = tpu.matmul %168, %167, %cst_39 {dimension_numbers = #tpu.dot_dimension_numbers<[1], [0], [0], [1], [0, 0, 1, 1], [], []>} : vector<16x8xf32>, vector<8x256xf32>, vector<16x256xf32> -> vector<16x256xf32>
    %c0_40 = arith.constant 0 : index
    %c0_41 = arith.constant 0 : index
    %170 = vector.load %arg13[%c0_40, %c0_41] : memref<16x1xf32, #tpu.memory_space<vmem>>, vector<16x1xf32>
    %171 = vector.broadcast %170 : vector<16x1xf32> to vector<16x256xf32>
    %172 = arith.addf %169, %171 : vector<16x256xf32>
    %173 = vector.extract_strided_slice %172 {offsets = [0, 0], sizes = [8, 256], strides = [1, 1]} : vector<16x256xf32> to vector<8x256xf32>
    %174 = vector.extract_strided_slice %172 {offsets = [8, 0], sizes = [8, 256], strides = [1, 1]} : vector<16x256xf32> to vector<8x256xf32>
    %175 = arith.mulf %173, %174 : vector<8x256xf32>
    %176 = vector.broadcast %10 : vector<8x1xf32> to vector<8x256xf32>
    %177 = arith.mulf %175, %176 : vector<8x256xf32>
    %c0_42 = arith.constant 0 : index
    %c0_43 = arith.constant 0 : index
    %178 = vector.load %arg14[%c0_42, %c0_43] : memref<8x8xf32, #tpu.memory_space<vmem>>, vector<8x8xf32>
    %cst_44 = arith.constant dense<0.000000e+00> : vector<8x256xf32>
    %179 = tpu.matmul %178, %177, %cst_44 {dimension_numbers = #tpu.dot_dimension_numbers<[1], [0], [0], [1], [0, 0, 1, 1], [], []>} : vector<8x8xf32>, vector<8x256xf32>, vector<8x256xf32> -> vector<8x256xf32>
    %c0_45 = arith.constant 0 : index
    %c0_46 = arith.constant 0 : index
    %180 = vector.load %arg15[%c0_45, %c0_46] : memref<8x1xf32, #tpu.memory_space<vmem>>, vector<8x1xf32>
    %181 = vector.broadcast %180 : vector<8x1xf32> to vector<8x256xf32>
    %182 = arith.addf %179, %181 : vector<8x256xf32>
    %183 = vector.broadcast %11 : vector<8x1xf32> to vector<8x256xf32>
    %184 = arith.mulf %182, %183 : vector<8x256xf32>
    %185 = arith.addf %147, %184 : vector<8x256xf32>
    %c0_47 = arith.constant 0 : index
    %c0_48 = arith.constant 0 : index
    %c0_49 = arith.constant 0 : index
    %186 = vector.load %arg16[%c0_47, %c0_48, %c0_49] : memref<1x8x256xf32, #tpu.memory_space<vmem>>, vector<1x8x256xf32>
    %187 = vector.shape_cast %186 : vector<1x8x256xf32> to vector<8x256xf32>
    %188 = vector.shape_cast %185 : vector<8x256xf32> to vector<1x8x256xf32>
    tpu.vector_store %arg16[%c0_47, %c0_48, %c0_49], %188 {strides = array<i32>} : memref<1x8x256xf32, #tpu.memory_space<vmem>>, vector<1x8x256xf32>,
    return
  }
  func.func @transform_0(%arg0: i32) -> (i32, i32, i32) {
    %c0_i32 = arith.constant 0 : i32
    %c0_i32_0 = arith.constant 0 : i32
    %c0_i32_1 = arith.constant 0 : i32
    return %arg0, %c0_i32, %c0_i32_0 : i32, i32, i32
  }
  func.func @transform_1(%arg0: i32) -> (i32, i32, i32) {
    %c0_i32 = arith.constant 0 : i32
    %c0_i32_0 = arith.constant 0 : i32
    %c0_i32_1 = arith.constant 0 : i32
    return %arg0, %c0_i32, %c0_i32_0 : i32, i32, i32
  }
  func.func @transform_2(%arg0: i32) -> (i32, i32) {
    %c0_i32 = arith.constant 0 : i32
    %c0_i32_0 = arith.constant 0 : i32
    %c0_i32_1 = arith.constant 0 : i32
    return %c0_i32, %c0_i32_0 : i32, i32
  }
  func.func @transform_3(%arg0: i32) -> (i32, i32) {
    %c0_i32 = arith.constant 0 : i32
    %c0_i32_0 = arith.constant 0 : i32
    %c0_i32_1 = arith.constant 0 : i32
    return %c0_i32, %c0_i32_0 : i32, i32
  }
  func.func @transform_4(%arg0: i32) -> (i32, i32) {
    %c0_i32 = arith.constant 0 : i32
    %c0_i32_0 = arith.constant 0 : i32
    %c0_i32_1 = arith.constant 0 : i32
    return %c0_i32, %c0_i32_0 : i32, i32
  }
  func.func @transform_5(%arg0: i32) -> (i32, i32) {
    %c0_i32 = arith.constant 0 : i32
    %c0_i32_0 = arith.constant 0 : i32
    %c0_i32_1 = arith.constant 0 : i32
    return %c0_i32, %c0_i32_0 : i32, i32
  }
  func.func @transform_6(%arg0: i32) -> (i32, i32) {
    %c0_i32 = arith.constant 0 : i32
    %c0_i32_0 = arith.constant 0 : i32
    %c0_i32_1 = arith.constant 0 : i32
    return %c0_i32, %c0_i32_0 : i32, i32
  }
  func.func @transform_7(%arg0: i32) -> (i32, i32) {
    %c0_i32 = arith.constant 0 : i32
    %c0_i32_0 = arith.constant 0 : i32
    %c0_i32_1 = arith.constant 0 : i32
    return %c0_i32, %c0_i32_0 : i32, i32
  }
  func.func @transform_8(%arg0: i32) -> (i32, i32) {
    %c0_i32 = arith.constant 0 : i32
    %c0_i32_0 = arith.constant 0 : i32
    %c0_i32_1 = arith.constant 0 : i32
    return %c0_i32, %c0_i32_0 : i32, i32
  }
  func.func @transform_9(%arg0: i32) -> (i32, i32) {
    %c0_i32 = arith.constant 0 : i32
    %c0_i32_0 = arith.constant 0 : i32
    %c0_i32_1 = arith.constant 0 : i32
    return %c0_i32, %c0_i32_0 : i32, i32
  }
  func.func @transform_10(%arg0: i32) -> (i32, i32) {
    %c0_i32 = arith.constant 0 : i32
    %c0_i32_0 = arith.constant 0 : i32
    %c0_i32_1 = arith.constant 0 : i32
    return %c0_i32, %c0_i32_0 : i32, i32
  }
  func.func @transform_11(%arg0: i32) -> (i32, i32) {
    %c0_i32 = arith.constant 0 : i32
    %c0_i32_0 = arith.constant 0 : i32
    %c0_i32_1 = arith.constant 0 : i32
    return %c0_i32, %c0_i32_0 : i32, i32
  }
  func.func @transform_12(%arg0: i32) -> (i32, i32) {
    %c0_i32 = arith.constant 0 : i32
    %c0_i32_0 = arith.constant 0 : i32
    %c0_i32_1 = arith.constant 0 : i32
    return %c0_i32, %c0_i32_0 : i32, i32
  }
  func.func @transform_13(%arg0: i32) -> (i32, i32) {
    %c0_i32 = arith.constant 0 : i32
    %c0_i32_0 = arith.constant 0 : i32
    %c0_i32_1 = arith.constant 0 : i32
    return %c0_i32, %c0_i32_0 : i32, i32
  }
  func.func @transform_14(%arg0: i32) -> (i32, i32) {
    %c0_i32 = arith.constant 0 : i32
    %c0_i32_0 = arith.constant 0 : i32
    %c0_i32_1 = arith.constant 0 : i32
    return %c0_i32, %c0_i32_0 : i32, i32
  }
  func.func @transform_15(%arg0: i32) -> (i32, i32, i32) {
    %c0_i32 = arith.constant 0 : i32
    %c0_i32_0 = arith.constant 0 : i32
    %c0_i32_1 = arith.constant 0 : i32
    return %arg0, %c0_i32, %c0_i32_0 : i32, i32, i32
  }
}

</mosaic_0001>

<bundles_post_ra>
// kernel: tpu_custom_call.1
= control target key start
LH: loop header
LB: loop body
LE: loop exit
PB: predicated region body
PF: predicated region fallthrough
CT: control target
= control target key end

     0   :  { %s2317_s0 = inlined_call_operand.vmem [shape: f32[2,8,256], index: 0, kind: input, shape index: {}]   ;;  %s2318_s1 = inlined_call_operand.vmem [shape: f32[2,8,8], index: 1, kind: input, shape index: {}]   ;;  %s2319_s2 = inlined_call_operand.vmem [shape: f32[9,256], index: 2, kind: input, shape index: {}]   ;;  %s2320_s3 = inlined_call_operand.vmem [shape: f32[16,8], index: 3, kind: input, shape index: {}]   ;;  %s2321_s4 = inlined_call_operand.vmem [shape: f32[16,1], index: 4, kind: input, shape index: {}]   ;;  %s2322_s5 = inlined_call_operand.vmem [shape: f32[16,9], index: 5, kind: input, shape index: {}]   ;;  %s2323_s6 = inlined_call_operand.vmem [shape: f32[16,1], index: 6, kind: input, shape index: {}]   ;;  %s2324_s7 = inlined_call_operand.vmem [shape: f32[8,8], index: 7, kind: input, shape index: {}]   ;;  %s2325_s8 = inlined_call_operand.vmem [shape: f32[8,1], index: 8, kind: input, shape index: {}]   ;;  %s2326_s9 = inlined_call_operand.hbm [shape: f32[8,8], index: 9, kind: input, shape index: {}]   ;;  %s2327_s10 = inlined_call_operand.vmem [shape: f32[8,1], index: 10, kind: input, shape index: {}]   ;;  %s2328_s11 = inlined_call_operand.vmem [shape: f32[16,8], index: 11, kind: input, shape index: {}]   ;;  %s2329_s12 = inlined_call_operand.vmem [shape: f32[16,1], index: 12, kind: input, shape index: {}]   ;;  %s2330_s13 = inlined_call_operand.vmem [shape: f32[8,8], index: 13, kind: input, shape index: {}]   ;;  %s2331_s14 = inlined_call_operand.vmem [shape: f32[8,1], index: 14, kind: input, shape index: {}]   ;;  %s2332_s15 = inlined_call_operand.hbm [shape: f32[2,8,256], index: 15, kind: output, shape index: {}]  }
   0x1   :  { %2343 = sst [smem:[#allocation8_spill]] %s2317_s0 }
   0x2   :  { %2344 = sst [smem:[#allocation9_spill]] %s2318_s1 }
   0x3   :  { %2345 = sst [smem:[#allocation10_spill]] %s2319_s2 }
   0x4   :  { %2346 = sst [smem:[#allocation11_spill]] %s2320_s3 }
   0x5   :  { %2347 = sst [smem:[#allocation12_spill]] %s2326_s9 }
   0x6   :  { %20 = vsyncpa [#allocation3], 0 }
   0x7   :  { %21 = vsyncpa [#allocation4], 0 }
   0x8   :  { %23 = vsyncpa [#allocation4 + $0x1], 0  ;;  %s1817_s18 = smov 0   ;;  %s1819_s19 = smov 0  }
   0x9   :  { %s1821_s20 = smov 0   ;;  %s1823_s21 = smov 0  }
   0xa LB: > { %s1838_s22 = sadd.s32 4294967295, %s1715_s21   ;;  %s1471_s23 = sadd.s32 4294967294, %s1715_s21   ;;  %s1715_s21 = sphi %s1823_s21, %s2363_s21   ;;  %s1711_s20 = sphi %s1821_s20, %s2362_s20   ;;  %s1707_s19 = sphi %s1819_s19, %s2361_s19   ;;  %s1703_s18 = sphi %s1817_s18, %s2360_s18  }
   0xb   : > { %s1842_s24 = sadd.s32 1, %s1715_s21   ;;  %s361_s25 = sadd.s32 1, %s1711_s20 }
   0xc   : > { %s358_s26 = ssub.s32 %s1715_s21, %s1842_s24  ;;  %p371_p0 = scmp.ne.s32.totalorder %s1711_s20, %s1707_s19 }
   0xd   : > { %p359_p1 = scmp.eq.s32.totalorder %s358_s26, 0  ;;  %p372_p2 = scmp.eq.s32.totalorder %s1838_s22, 1 }
   0xe   : > { %p377_p3 = scmp.ne.s32.totalorder %s1707_s19, %s1703_s18  ;;  %p378_p4 = scmp.eq.s32.totalorder %s1471_s23, 1 }
   0xf   : > { %s1853_s27 = scalar_select %p359_p1, %s1711_s20, %s361_s25  }
  0x10   : > { %p1855_p5 = por %p372_p2, %p371_p0  ;;  %p1859_p6 = por %p378_p4, %p377_p3 }
  0x11   : > { %p1472_p7 = scmp.ge.s32.totalorder %s1715_s21, 1  ;;  %p385_p8 = scmp.lt.s32.totalorder %s1715_s21, 3 }
  0x12   : > { %p1516_p9 = scmp.eq.s32.totalorder %s1838_s22, 0  ;;  %s2350_s9 = sld [smem:[#allocation12_spill]] }
  0x13   : > { %p386_p10 = pnand %p1472_p7, %p385_p8  ;;  %s1717_s23 = smov [#allocation2]  }
  0x14   : > { %s420_s25 = sshll.u32 %s1717_s23, 4  ;;  %s421_s25 = int_to_ptr.vmem [resolvable:$true] %s420_s25 }
  0x15   : > { %p1508_p11 = pneg %p386_p10  ;;  %463 = sbr.rel (%p386_p10) target bundleno = 1372 (0x55c), region = 80 }
  0x17   : > { %p1509_p12 = pnand %p1516_p9, %p1508_p11 }
  0x18   : > { %s418_s17 = sshll.u32 %s2350_s9, 4  ;;  %s419_s17 = int_to_ptr.hbm [resolvable:$true] %s418_s17 }
  0x19   : > { %1511 = dma.hbm_to_vmem [thread:$0]  (!%p1509_p12), %s419_s17, 128, %s421_s25, [#allocation3]  }
  0x1a   : > { %1694 = dma.done.wait (%p1516_p9), [#allocation3], 128  }
  0x1b   : > { %1696 = vsyncadd (%p1516_p9), [#allocation3], 4294967168  ;;  %p516_p13 = scmp.lt.s32.totalorder %s1838_s22, 1  ;;  %v1718_v0 = vmov 0   ;;  %s2351_s1 = sld [smem:[#allocation9_spill]]  ;;  %v1719_v2 = vmov 1  }
  0x1c   : > { %1571 = vset.pattern.permute.xlu0 %v1718_v0  ;;  %1573 = vset.pattern.permute.xlu1 %v1718_v0  ;;  %v1720_v3 = vmov 8.0   ;;  %s2352_s0 = sld [smem:[#allocation8_spill]]  ;;  %v614_v46 = vld [vmem:[%s2321_s4] sm:$0xff]  ;;  %v615_v51 = vld [vmem:[%s2321_s4 + $0x8] sm:$0xff]  ;;  %v1721_v58 = vmov 4   ;;  %vm626_vm7 = vcmask 64512  }
  0x1d   : > { %s517_s26 = scalar_select %p516_p13, %s1838_s22, 1  ;;  %1606 = vrcp.f32 %v1720_v3  ;;  %618 = vperm.xlu1 %1573, %v614_v46   ;;  %v1913_v56 = vld [vmem:[%s2322_s5] sm:$0xff]  ;;  %v1918_v57 = vld [vmem:[%s2322_s5 + $0x8] sm:$0xff]  ;;  %1575 = vset.pattern.permute.xlu2 %v1721_v58  ;;  %vm748_vm8 = vcmask 130048   ;;  %vm789_vm9 = vcmask 121856   ;;  %vm707_vm10 = vcmask 138240  }
  0x1e   : > { %686 = vperm.xlu2 %1575, %v1918_v57   ;;  %s2353_s3 = sld [smem:[#allocation11_spill]]  ;;  %s2333_s16 = smov 17   ;;  %vm830_vm11 = vcmask 7168   ;;  %vm869_vm12 = vcmask 1039360   ;;  %vm910_vm13 = vcmask 924672   ;;  %vm951_vm14 = vcmask 916480  }
  0x1f   : > { %s1480_s30 = sshll.u32 %s517_s26, 3  ;;  %s1500_s17 = sshll.u32 %s517_s26, 4  ;;  %vm992_vm15 = vcmask 908288  }
  0x20   : > { %s2337_s26 = smov 16   ;;  %s2335_s9 = smov 127  }
  0x21   : > { %s1876_s23 = scalar_lea.vmem %s2351_s1, %s1480_s30  ;;  %s1731_s25 = smov 15  }
  0x22   : > { %v1879_v1 = vld [vmem:[%s1876_s23] sm:$0xff]  ;;  %s520_s30 = scalar_lea.vmem %s2352_s0, %s1500_s17  ;;  %s1729_s17 = smov 1  }
  0x23   : > { %601 = vperm.xlu0 %1571, %v1879_v1   ;;  %v1607_v4 = vpop.eup %1606  ;;  %v1888_v7 = vld [vmem:[%s520_s30] sm:$0xff]  ;;  %v1890_v8 = vld [vmem:[%s520_s30 + $0x8] sm:$0xff]  ;;  %s2339_s30 = smov 113   ;;  %s2359_s2 = sld [smem:[#allocation10_spill]] }
  0x24   : > { %v549_v5 = vmul.f32 8.0, %v1607_v4  ;;  %v536_v9 = vrot.slane %v1888_v7, 4  ;;  %v542_v10 = vrot.slane %v1890_v8, 4  ;;  %vm553_vm0 = vweird.f32 %v1607_v4 }
  0x25   : > { %623 = vperm.xlu1 %1573, %v615_v51  }
  0x26   : > { %v550_v6 = vsub.f32 1.0, %v549_v5  ;;  %v537_v12 = vadd.f32 %v536_v9, %v1888_v7  ;;  %v543_v13 = vadd.f32 %v542_v10, %v1890_v8  ;;  %1579 = vset.pattern.permute.xlu2 %v1719_v2 }
  0x27   : > { %768 = vperm.xlu2 %1579, %v1918_v57  }
  0x28   : > { %v551_v11 = vmul.f32 %v1607_v4, %v550_v6  ;;  %v538_v14 = vrot.slane %v537_v12, 2  ;;  %v544_v15 = vrot.slane %v543_v13, 2 }
  0x2a   : > { %v552_v16 = vadd.f32 %v1607_v4, %v551_v11  ;;  %v539_v17 = vadd.f32 %v538_v14, %v537_v12  ;;  %v545_v18 = vadd.f32 %v544_v15, %v543_v13  ;;  %v1722_v11 = vmov 2   ;;  %v612_v15 = vld [vmem:[%s2353_s3] sm:$0xff] }
  0x2b   : > { %1572 = vset.pattern.permute.xlu0 %v1719_v2 }
  0x2c   : > { %607 = vperm.xlu0 %1572, %v1879_v1   ;;  %v540_v19 = vrot.slane %v539_v17, 1  ;;  %v546_v20 = vrot.slane %v545_v18, 1  ;;  %v1896_v21 = vsel %vm553_vm0, %v1607_v4, %v552_v16  ;;  %v613_v16 = vld [vmem:[%s2353_s3 + $0x8] sm:$0xff] }
  0x2d   : > { %1574 = vset.pattern.permute.xlu1 %v1721_v58 }
  0x2e   : > { %v541_v22 = vadd.f32 %v540_v19, %v539_v17  ;;  %v547_v23 = vadd.f32 %v546_v20, %v545_v18  ;;  %681 = vperm.xlu1 %1574, %v1913_v56   ;;  %v1724_v17 = vmov 5   ;;  %v1725_v18 = vmov 6  }
  0x2f   : > { %1581 = vset.pattern.permute.xlu2 %v1722_v11  ;;  %v1726_v19 = vmov 7  }
  0x30   : > { %v555_v24 = vmul.f32 %v1896_v21, %v541_v22  ;;  %v556_v25 = vmul.f32 %v1896_v21, %v547_v23  ;;  %809 = vperm.xlu2 %1581, %v1918_v57  }
  0x32   : > { %v557_v26 = vsub.f32 %v1888_v7, %v555_v24  ;;  %v558_v27 = vsub.f32 %v1890_v8, %v556_v25 }
  0x34   : > { %1576 = vset.pattern.permute.xlu0 %v1718_v0  ;;  %v559_v28 = vmul.f32 %v557_v26, %v557_v26  ;;  %v560_v29 = vmul.f32 %v558_v27, %v558_v27 }
  0x35   : > { %723 = vperm.xlu0 %1576, %v1913_v56  }
  0x36   : > { %v561_v30 = vrot.slane %v559_v28, 4  ;;  %v567_v31 = vrot.slane %v560_v29, 4  ;;  %1577 = vset.pattern.permute.xlu1 %v1718_v0 }
  0x37   : > { %727 = vperm.xlu1 %1577, %v1918_v57  }
  0x38   : > { %v562_v32 = vadd.f32 %v561_v30, %v559_v28  ;;  %v568_v33 = vadd.f32 %v567_v31, %v560_v29 }
  0x3a   : > { %v563_v34 = vrot.slane %v562_v32, 2  ;;  %v569_v35 = vrot.slane %v568_v33, 2 }
  0x3c   : > { %v564_v36 = vadd.f32 %v563_v34, %v562_v32  ;;  %v570_v37 = vadd.f32 %v569_v35, %v568_v33 }
  0x3e   : > { %v565_v38 = vrot.slane %v564_v36, 1  ;;  %v571_v39 = vrot.slane %v570_v37, 1 }
  0x3f   : > { %1578 = vset.pattern.permute.xlu1 %v1719_v2  ;;  %v1723_v2 = vmov 3  }
  0x40   : > { %v566_v40 = vadd.f32 %v565_v38, %v564_v36  ;;  %v572_v41 = vadd.f32 %v571_v39, %v570_v37  ;;  %764 = vperm.xlu1 %1578, %v1913_v56   ;;  %1583 = vset.pattern.permute.xlu2 %v1723_v2 }
  0x41   : > { %850 = vperm.xlu2 %1583, %v1918_v57  }
  0x42   : > { %v573_v42 = vmul.f32 %v566_v40, %v1896_v21  ;;  %v574_v43 = vmul.f32 %v572_v41, %v1896_v21  ;;  %v1735_v40 = vmov 8  }
  0x43   : > { %1590 = vset.pattern.permute.xlu0 %v1735_v40 }
  0x44   : > { %v575_v44 = vadd.f32 1e-06, %v573_v42  ;;  %v576_v45 = vadd.f32 1e-06, %v574_v43 }
  0x46   : > { %1608 = vrsqrt.f32 %v575_v44  ;;  %vm583_vm1 = vweird.f32 %v575_v44  ;;  %vm593_vm3 = vweird.f32 %v576_v45 }
  0x47   : > { %1610 = vrsqrt.f32 %v576_v45 }
  0x48   : > { %1580 = vset.pattern.permute.xlu1 %v1722_v11 }
  0x49   : > { %805 = vperm.xlu1 %1580, %v1913_v56   ;;  %1585 = vset.pattern.permute.xlu2 %v1724_v17 }
  0x4a   : > { %891 = vperm.xlu2 %1585, %v1918_v57  }
  0x4c   : > { %v1609_v47 = vpop.eup %1608 }
  0x4d   : > { %v1611_v48 = vpop.eup %1610  ;;  %v578_v49 = vmul.f32 %v1609_v47, %v575_v44  ;;  %vm584_vm2 = vweird.f32 %v1609_v47  ;;  %v535_v44 = vld [vmem:[%s2323_s6 + $0x8] sm:$0xff] }
  0x4e   : > { %v588_v50 = vmul.f32 %v1611_v48, %v576_v45  ;;  %vm594_vm4 = vweird.f32 %v1611_v48  ;;  %vm585_vm5 = vmor %vm583_vm1, %vm584_vm2 }
  0x4f   : > { %v579_v52 = vmul.f32 %v1609_v47, %v578_v49  ;;  %vm595_vm6 = vmor %vm593_vm3, %vm594_vm4 }
  0x50   : > { %v589_v53 = vmul.f32 %v1611_v48, %v588_v50  ;;  %v534_v50 = vld [vmem:[%s2323_s6] sm:$0xff] }
  0x51   : > { %v580_v54 = vmul.f32 0.5, %v579_v52  ;;  %1582 = vset.pattern.permute.xlu1 %v1723_v2 }
  0x52   : > { %v590_v55 = vmul.f32 0.5, %v589_v53  ;;  %846 = vperm.xlu1 %1582, %v1913_v56   ;;  %1587 = vset.pattern.permute.xlu2 %v1725_v18 }
  0x53   : > { %v581_v59 = vsub.f32 1.5, %v580_v54  ;;  %932 = vperm.xlu2 %1587, %v1918_v57  }
  0x54   : > { %v591_v60 = vsub.f32 1.5, %v590_v55  ;;  %v2056_v55 = vld [vmem:[%s2359_s2] sm:$0xff] }
  0x55   : > { %v582_v61 = vmul.f32 %v1609_v47, %v581_v59 }
  0x56   : > { %v592_v62 = vmul.f32 %v1611_v48, %v591_v60 }
  0x57   : > { %v586_v3 = vsel %vm585_vm5, %v1609_v47, %v582_v61 }
  0x58   : > { %v596_v4 = vsel %vm595_vm6, %v1611_v48, %v592_v62  ;;  %v597_v5 = vmul.f32 %v586_v3, %v557_v26  ;;  %v716_v3 = vperm.slane %v2056_v55, 0 }
  0x59   : > { %v598_v6 = vmul.f32 %v596_v4, %v558_v27 }
  0x5a   : > { %1584 = vset.pattern.permute.xlu1 %v1724_v17 }
  0x5b   : > { %887 = vperm.xlu1 %1584, %v1913_v56   ;;  %1589 = vset.pattern.permute.xlu2 %v1726_v19 }
  0x5c   : > { %973 = vperm.xlu2 %1589, %v1918_v57  }
  0x63   : > { %1586 = vset.pattern.permute.xlu1 %v1725_v18 }
  0x64   : > { %928 = vperm.xlu1 %1586, %v1913_v56   ;;  %1592 = vset.pattern.permute.xlu2 %v1718_v0 }
  0x6c   : > { %1588 = vset.pattern.permute.xlu1 %v1726_v19 }
  0x6d   : > { %969 = vperm.xlu1 %1588, %v1913_v56  }
  0x75   : > { %1591 = vset.pattern.permute.xlu1 %v1735_v40 }
  0x78   : > { %v1974_v30 = vpop.permute.xlu2 %686 }
  0x81   : > { %v1978_v31 = vpop.permute.xlu2 %768 }
  0x8a   : > { %v1988_v34 = vpop.permute.xlu2 %809 }
  0x8f   : > { %v619_v20 = vpop.permute.xlu1 %618 }
  0x95   : > { %v602_v63 = vpop.permute.xlu0 %601 }
  0x96   : > { %v604_v9 = vmul.f32 %v602_v63, %v597_v5  ;;  %v605_v10 = vmul.f32 %v602_v63, %v598_v6  ;;  %v798_v6 = vperm.slane %v2056_v55, 2 }
  0x97   : > { %v624_v22 = vpop.permute.xlu1 %623 }
  0x9b   : > { %v2001_v38 = vpop.permute.xlu2 %850 }
  0x9e   : > { %v608_v12 = vpop.permute.xlu0 %607 }
  0x9f   : > { %v610_v13 = vadd.f32 %v608_v12, %v604_v9  ;;  %v611_v14 = vadd.f32 %v608_v12, %v605_v10 }
  0xa0   : > { %v682_v23 = vpop.permute.xlu1 %681 }
  0xa1   : > { %648 = vmatpush.msra.mxu0 %v610_v13  ;;  %671 = vmatpush.msra.mxu1 %v611_v14 }
  0xa2   : > { %1481 = vmatmul.msk.f32.vlgmr.msra.gmra.mxu0 %vm626_vm7, %v612_v15  ;;  %1483 = vmatmul.msk.f32.vlgmr.msra.gmra.mxu1 %vm626_vm7, %v612_v15 }
  0xa4   : > { %v2010_v41 = vpop.permute.xlu2 %891 }
  0xa7   : > { %v724_v52 = vpop.permute.xlu0 %723 }
  0xa9   : > { %v1992_v36 = vpop.permute.xlu1 %727 }
  0xaa   : > { %1482 = vmatmul.msk.f32.gmra.mxu0 %vm626_vm7, %v613_v16  ;;  %1484 = vmatmul.msk.f32.gmra.mxu1 %vm626_vm7, %v613_v16 }
  0xad   : > { %v2019_v43 = vpop.permute.xlu2 %932 }
  0xb2   : > { %v2003_v39 = vpop.permute.xlu1 %764 }
  0xb6   : > { %v2035_v46 = vpop.permute.xlu2 %973 }
  0xbb   : > { %v2016_v42 = vpop.permute.xlu1 %805 }
  0xc4   : > { %v2029_v45 = vpop.permute.xlu1 %846 }
  0xcd   : > { %v2037_v47 = vpop.permute.xlu1 %887 }
  0xd6   : > { %v2041_v49 = vpop.permute.xlu1 %928 }
  0xdf   : > { %v2049_v53 = vpop.permute.xlu1 %969 }
 0x11f   : > { %v650_v24 = vpop.f32.mrf.mxu0  ;;  %v673_v25 = vpop.f32.mrf.mxu1 }
 0x120   : > { %v651_v26 = vadd.f32 %v650_v24, %v619_v20  ;;  %v674_v27 = vadd.f32 %v673_v25, %v619_v20 }
 0x122   : > { %v1962_v28 = vmul.f32 %v682_v23, %v651_v26  ;;  %v1964_v29 = vmul.f32 %v682_v23, %v674_v27  ;;  %738 = vrot.lane.b32.xlu0 %v674_v27, %s2337_s26  ;;  %695 = vrot.lane.b32.xlu2 %v674_v27, %s2333_s16 }
 0x123   : > { %703 = vrot.lane.b32.xlu1 %v651_v26, %s2333_s16  ;;  %s1733_s16 = smov 112  }
 0x127   : > { %v676_v32 = vpop.f32.mrf.mxu1  ;;  %v653_v35 = vpop.f32.mrf.mxu0 }
 0x128   : > { %v1983_v33 = vadd.f32 %v676_v32, %v624_v22  ;;  %v1994_v37 = vadd.f32 %v653_v35, %v624_v22  ;;  %v839_v22 = vperm.slane %v2056_v55, 3 }
 0x12a   : > { %820 = vrot.lane.b32.xlu0 %v674_v27, %s1729_s17  ;;  %744 = vrot.lane.b32.xlu2 %v651_v26, %s2337_s26  ;;  %s2354_s26 = smov 17  }
 0x12b   : > { %863 = vrot.lane.b32.xlu1 %v674_v27, %s2335_s9 }
 0x132   : > { %861 = vrot.lane.b32.xlu0 %v651_v26, %s2335_s9  ;;  %779 = vrot.lane.b32.xlu2 %v674_v27, %s1731_s25  ;;  %s2341_s9 = smov 111  }
 0x133   : > { %904 = vrot.lane.b32.xlu1 %v674_v27, %s2339_s30 }
 0x13a   : > { %902 = vrot.lane.b32.xlu0 %v651_v26, %s2339_s30  ;;  %785 = vrot.lane.b32.xlu2 %v651_v26, %s1731_s25  ;;  %s2355_s30 = smov 16  }
 0x13b   : > { %945 = vrot.lane.b32.xlu1 %v674_v27, %s1733_s16 }
 0x142   : > { %943 = vrot.lane.b32.xlu0 %v651_v26, %s1733_s16  ;;  %826 = vrot.lane.b32.xlu2 %v651_v26, %s1729_s17 }
 0x143   : > { %986 = vrot.lane.b32.xlu1 %v674_v27, %s2341_s9 }
 0x14a   : > { %984 = vrot.lane.b32.xlu0 %v651_v26, %s2341_s9  ;;  %697 = vrot.lane.b32.xlu2 %v1983_v33, %s2354_s26  ;;  %s2356_s9 = smov 127  }
 0x14b   : > { %740 = vrot.lane.b32.xlu1 %v1983_v33, %s2355_s30 }
 0x152   : > { %746 = vrot.lane.b32.xlu0 %v1994_v37, %s2355_s30  ;;  %705 = vrot.lane.b32.xlu2 %v1994_v37, %s2354_s26  ;;  %s2357_s26 = smov 113   ;;  %s1501_s30 = sshll.u32 %s1838_s22, 4 }
 0x153   : > { %781 = vrot.lane.b32.xlu1 %v1983_v33, %s1731_s25  ;;  %s1383_s0 = scalar_lea.hbm %s2332_s15, %s1501_s30 }
 0x154   : > { %s1387_s1 = sshll.u32 %s1383_s0, 4  ;;  %s1669_s0 = scalar_lea.hbm %s2332_s15, 32  ;;  %s1388_s1 = int_to_ptr.hbm [resolvable:$true] %s1387_s1 }
 0x15a   : > { %787 = vrot.lane.b32.xlu0 %v1994_v37, %s1731_s25  ;;  %865 = vrot.lane.b32.xlu2 %v1994_v37, %s2356_s9 }
 0x15b   : > { %822 = vrot.lane.b32.xlu1 %v1983_v33, %s1729_s17 }
 0x162   : > { %828 = vrot.lane.b32.xlu0 %v1994_v37, %s1729_s17  ;;  %906 = vrot.lane.b32.xlu2 %v1994_v37, %s2357_s26  ;;  %s2358_s17 = smov 111  }
 0x163   : > { %1014 = vperm.xlu1 %1591, %v1918_v57   ;;  %v2061_v57 = vld [vmem:[%s2359_s2 + $0x8] sm:$0xff] }
 0x164   : > { %v758_v59 = vperm.slane %v2061_v57, 1  ;;  %v717_v4 = vperm.slane %v2061_v57, 0  ;;  %v799_v9 = vperm.slane %v2061_v57, 2  ;;  %v840_v23 = vperm.slane %v2061_v57, 3 }
 0x16a   : > { %867 = vrot.lane.b32.xlu0 %v1983_v33, %s2356_s9  ;;  %947 = vrot.lane.b32.xlu2 %v1994_v37, %s1733_s16 }
 0x16b   : > { %1593 = vset.pattern.permute.xlu1 %v1718_v0 }
 0x16c   : > { %1032 = vperm.xlu1 %1593, %v535_v44  }
 0x172   : > { %908 = vrot.lane.b32.xlu0 %v1983_v33, %s2357_s26  ;;  %988 = vrot.lane.b32.xlu2 %v1994_v37, %s2358_s17  ;;  %s513_s26 = sand.u32 1, %s1707_s19  }
 0x173   : > { %s1372_s22 = scalar_lea.sflag [#allocation4], %s513_s26 }
 0x17a   : > { %949 = vrot.lane.b32.xlu0 %v1983_v33, %s1733_s16  ;;  %1027 = vperm.xlu2 %1592, %v534_v50  }
 0x17c   : > { %v696_v48 = vpop.permute.xlu2 %695 }
 0x182   : > { %990 = vrot.lane.b32.xlu0 %v1983_v33, %s2358_s17  ;;  %1594 = vset.pattern.permute.xlu2 %v1722_v11  ;;  %s1663_s17 = sshra.s32 %s1388_s1, 4  ;;  %s1664_s17 = int_to_ptr.hbm [resolvable:$true] %s1663_s17 }
 0x183   : > { %1042 = vperm.xlu2 %1594, %v1879_v1   ;;  %s1665_s30 = scalar_lea.hbm %s1664_s17, 16  ;;  %p1670_p3 = scmp.lt.s32.totalorder %s1664_s17, %s2332_s15 }
 0x184   : > { %v745_v51 = vpop.permute.xlu2 %744  ;;  %p1666_p0 = scmp.ne.s32.totalorder %s1664_s17, %s1665_s30  ;;  %p1671_p4 = scmp.lt.s32.totalorder %s1669_s0, %s1665_s30 }
 0x186   : > { %p1667_p1 = pnand %p1666_p0, %p1855_p5  ;;  %p1672_p7 = por %p1671_p4, %p1670_p3 }
 0x188   : > { %p1668_p2 = pneg %p1667_p1 }
 0x18a   : > { %1010 = vperm.xlu0 %1590, %v1913_v56   ;;  %v757_v56 = vperm.slane %v2056_v55, 1  ;;  %p1673_p8 = pnand %p1672_p7, %p1668_p2 }
 0x18b   : > { %1595 = vset.pattern.permute.xlu2 %v1718_v0 }
 0x18c   : > { %v780_v54 = vpop.permute.xlu2 %779 }
 0x192   : > { %1603 = vset.pattern.permute.xlu0 %v1726_v19 }
 0x194   : > { %v739_v60 = vpop.permute.xlu0 %738  ;;  %v786_v61 = vpop.permute.xlu2 %785 }
 0x195   : > { %v749_v62 = vsel %vm748_vm8, %v745_v51, %v739_v60  ;;  %v755_v63 = vsel %vm748_vm8, %v739_v60, %v745_v51  ;;  %v704_v5 = vpop.permute.xlu1 %703  ;;  %v790_v14 = vsel %vm789_vm9, %v786_v61, %v780_v54  ;;  %v796_v15 = vsel %vm789_vm9, %v780_v54, %v786_v61 }
 0x196   : > { %v708_v10 = vsel %vm707_vm10, %v704_v5, %v696_v48  ;;  %v714_v11 = vsel %vm707_vm10, %v696_v48, %v704_v5  ;;  %v759_v12 = vmul.f32 %v757_v56, %v755_v63  ;;  %v760_v13 = vmul.f32 %v758_v59, %v749_v62 }
 0x197   : > { %v718_v16 = vmul.f32 %v716_v3, %v714_v11  ;;  %v719_v20 = vmul.f32 %v717_v4, %v708_v10  ;;  %v800_v24 = vmul.f32 %v798_v6, %v796_v15  ;;  %v801_v25 = vmul.f32 %v799_v9, %v790_v14 }
 0x198   : > { %v771_v32 = vmul.f32 %v2003_v39, %v759_v12  ;;  %v772_v35 = vmul.f32 %v2003_v39, %v760_v13  ;;  %v880_v12 = vperm.slane %v2056_v55, 5  ;;  %v881_v13 = vperm.slane %v2061_v57, 5 }
 0x199   : > { %v730_v26 = vmul.f32 %v724_v52, %v718_v16  ;;  %v731_v27 = vmul.f32 %v724_v52, %v719_v20  ;;  %v812_v61 = vmul.f32 %v2016_v42, %v800_v24  ;;  %v813_v39 = vmul.f32 %v2016_v42, %v801_v25 }
 0x19b   : > { %v734_v48 = vadd.f32 %v730_v26, %v1962_v28  ;;  %v735_v50 = vadd.f32 %v731_v27, %v1964_v29 }
 0x19c   : > { %v821_v40 = vpop.permute.xlu0 %820  ;;  %v827_v44 = vpop.permute.xlu2 %826 }
 0x19d   : > { %v831_v51 = vsel %vm830_vm11, %v827_v44, %v821_v40  ;;  %v837_v54 = vsel %vm830_vm11, %v821_v40, %v827_v44  ;;  %v775_v62 = vadd.f32 %v771_v32, %v734_v48  ;;  %v776_v63 = vadd.f32 %v772_v35, %v735_v50  ;;  %v864_v5 = vpop.permute.xlu1 %863 }
 0x19e   : > { %v841_v60 = vmul.f32 %v839_v22, %v837_v54  ;;  %v842_v52 = vmul.f32 %v840_v23, %v831_v51  ;;  %v921_v40 = vperm.slane %v2056_v55, 6  ;;  %v922_v44 = vperm.slane %v2061_v57, 6 }
 0x19f   : > { %v816_v10 = vadd.f32 %v812_v61, %v775_v62  ;;  %v817_v11 = vadd.f32 %v813_v39, %v776_v63  ;;  %v962_v62 = vperm.slane %v2056_v55, 7  ;;  %v963_v63 = vperm.slane %v2061_v57, 7 }
 0x1a0   : > { %v853_v28 = vmul.f32 %v2029_v45, %v841_v60  ;;  %v854_v29 = vmul.f32 %v2029_v45, %v842_v52 }
 0x1a2   : > { %v857_v14 = vadd.f32 %v853_v28, %v816_v10  ;;  %v858_v15 = vadd.f32 %v854_v29, %v817_v11 }
 0x1a4   : > { %v862_v16 = vpop.permute.xlu0 %861 }
 0x1a5   : > { %v870_v20 = vsel %vm869_vm12, %v862_v16, %v864_v5  ;;  %v878_v42 = vsel %vm869_vm12, %v864_v5, %v862_v16  ;;  %v905_v35 = vpop.permute.xlu1 %904 }
 0x1a6   : > { %v882_v24 = vmul.f32 %v880_v12, %v870_v20  ;;  %v883_v45 = vmul.f32 %v881_v13, %v878_v42 }
 0x1a8   : > { %v894_v25 = vmul.f32 %v2037_v47, %v882_v24  ;;  %v895_v26 = vmul.f32 %v2037_v47, %v883_v45  ;;  %v698_v24 = vpop.permute.xlu2 %697 }
 0x1aa   : > { %v898_v27 = vadd.f32 %v894_v25, %v857_v14  ;;  %v899_v32 = vadd.f32 %v895_v26, %v858_v15 }
 0x1ac   : > { %v903_v48 = vpop.permute.xlu0 %902 }
 0x1ad   : > { %v911_v50 = vsel %vm910_vm13, %v903_v48, %v905_v35  ;;  %v919_v51 = vsel %vm910_vm13, %v905_v35, %v903_v48  ;;  %v946_v28 = vpop.permute.xlu1 %945 }
 0x1ae   : > { %v923_v54 = vmul.f32 %v921_v40, %v911_v50  ;;  %v924_v60 = vmul.f32 %v922_v44, %v919_v51 }
 0x1b0   : > { %v935_v47 = vmul.f32 %v2041_v49, %v923_v54  ;;  %v936_v52 = vmul.f32 %v2041_v49, %v924_v60  ;;  %v706_v25 = vpop.permute.xlu2 %705 }
 0x1b1   : > { %v715_v60 = vsel %vm707_vm10, %v698_v24, %v706_v25 }
 0x1b2   : > { %v939_v61 = vadd.f32 %v935_v47, %v898_v27  ;;  %v940_v39 = vadd.f32 %v936_v52, %v899_v32 }
 0x1b4   : > { %v944_v29 = vpop.permute.xlu0 %943 }
 0x1b5   : > { %v952_v5 = vsel %vm951_vm14, %v944_v29, %v946_v28  ;;  %v960_v10 = vsel %vm951_vm14, %v946_v28, %v944_v29  ;;  %v2141_v26 = vpop.permute.xlu1 %986 }
 0x1b6   : > { %v964_v11 = vmul.f32 %v962_v62, %v952_v5  ;;  %v965_v14 = vmul.f32 %v963_v63, %v960_v10 }
 0x1b8   : > { %v976_v49 = vmul.f32 %v2049_v53, %v964_v11  ;;  %v977_v15 = vmul.f32 %v2049_v53, %v965_v14  ;;  %v866_v32 = vpop.permute.xlu2 %865  ;;  %v709_v53 = vsel %vm707_vm10, %v706_v25, %v698_v24  ;;  %v692_v25 = vmul.f32 %v1974_v30, %v1983_v33 }
 0x1b9   : > { %v721_v28 = vmul.f32 %v717_v4, %v709_v53 }
 0x1ba   : > { %v2135_v16 = vadd.f32 %v976_v49, %v939_v61  ;;  %v2137_v20 = vadd.f32 %v977_v15, %v940_v39  ;;  %v720_v39 = vmul.f32 %v716_v3, %v715_v60 }
 0x1bb   : > { %v733_v24 = vmul.f32 %v1992_v36, %v721_v28 }
 0x1bc   : > { %v2139_v42 = vpop.permute.xlu0 %984  ;;  %v732_v15 = vmul.f32 %v1992_v36, %v720_v39 }
 0x1bd   : > { %v741_v35 = vpop.permute.xlu1 %740 }
 0x1c0   : > { %v907_v50 = vpop.permute.xlu2 %906 }
 0x1c4   : > { %v747_v45 = vpop.permute.xlu0 %746 }
 0x1c5   : > { %v782_v54 = vpop.permute.xlu1 %781  ;;  %v750_v47 = vsel %vm748_vm8, %v747_v45, %v741_v35  ;;  %v756_v52 = vsel %vm748_vm8, %v741_v35, %v747_v45 }
 0x1c6   : > { %v761_v5 = vmul.f32 %v757_v56, %v756_v52  ;;  %v762_v10 = vmul.f32 %v758_v59, %v750_v47  ;;  %v691_v59 = vmul.f32 %v1974_v30, %v1994_v37  ;;  %v737_v37 = vadd.f32 %v733_v24, %v692_v25 }
 0x1c8   : > { %v948_v29 = vpop.permute.xlu2 %947  ;;  %v774_v36 = vmul.f32 %v1978_v31, %v762_v10  ;;  %v736_v53 = vadd.f32 %v732_v15, %v691_v59  ;;  %v993_v59 = vsel %vm992_vm15, %v2139_v42, %v2141_v26 }
 0x1cc   : > { %v788_v27 = vpop.permute.xlu0 %787 }
 0x1cd   : > { %v791_v11 = vsel %vm789_vm9, %v788_v27, %v782_v54  ;;  %v797_v14 = vsel %vm789_vm9, %v782_v54, %v788_v27  ;;  %v823_v49 = vpop.permute.xlu1 %822  ;;  %v773_v27 = vmul.f32 %v1978_v31, %v761_v5 }
 0x1ce   : > { %v802_v45 = vmul.f32 %v798_v6, %v797_v14  ;;  %v803_v56 = vmul.f32 %v799_v9, %v791_v11 }
 0x1cf   : > { %v777_v47 = vadd.f32 %v773_v27, %v736_v53 }
 0x1d0   : > { %v814_v60 = vmul.f32 %v1988_v34, %v802_v45  ;;  %v815_v30 = vmul.f32 %v1988_v34, %v803_v56 }
 0x1d2   : > { %v818_v5 = vadd.f32 %v814_v60, %v777_v47 }
 0x1d4   : > { %v829_v48 = vpop.permute.xlu0 %828 }
 0x1d5   : > { %v832_v3 = vsel %vm830_vm11, %v829_v48, %v823_v49  ;;  %v838_v4 = vsel %vm830_vm11, %v823_v49, %v829_v48  ;;  %v1015_v49 = vpop.permute.xlu1 %1014 }
 0x1d6   : > { %v843_v35 = vmul.f32 %v839_v22, %v838_v4  ;;  %v844_v48 = vmul.f32 %v840_v23, %v832_v3  ;;  %v778_v22 = vadd.f32 %v774_v36, %v737_v37 }
 0x1d8   : > { %v856_v39 = vmul.f32 %v2001_v38, %v844_v48 }
 0x1dc   : > { %v868_v51 = vpop.permute.xlu0 %867 }
 0x1dd   : > { %v871_v6 = vsel %vm869_vm12, %v866_v32, %v868_v51  ;;  %v879_v9 = vsel %vm869_vm12, %v868_v51, %v866_v32  ;;  %v989_v32 = vpop.permute.xlu2 %988  ;;  %v855_v51 = vmul.f32 %v2001_v38, %v843_v35 }
 0x1de   : > { %v884_v23 = vmul.f32 %v880_v12, %v871_v6  ;;  %v885_v52 = vmul.f32 %v881_v13, %v879_v9  ;;  %v819_v12 = vadd.f32 %v815_v30, %v778_v22 }
 0x1e0   : > { %v896_v10 = vmul.f32 %v2010_v41, %v884_v23  ;;  %v897_v13 = vmul.f32 %v2010_v41, %v885_v52  ;;  %v860_v14 = vadd.f32 %v856_v39, %v819_v12 }
 0x1e2   : > { %v901_v4 = vadd.f32 %v897_v13, %v860_v14 }
 0x1e4   : > { %v909_v61 = vpop.permute.xlu0 %908 }
 0x1e5   : > { %v912_v33 = vsel %vm910_vm13, %v907_v50, %v909_v61  ;;  %v920_v31 = vsel %vm910_vm13, %v909_v61, %v907_v50  ;;  %v1028_v25 = vpop.permute.xlu2 %1027 }
 0x1e6   : > { %v925_v50 = vmul.f32 %v921_v40, %v912_v33  ;;  %v926_v61 = vmul.f32 %v922_v44, %v920_v31  ;;  %v1604_v40 = vld [vmem:[%s2359_s2 + $0x10] ss:$0 sm:$0xff]  ;;  %v1605_v44 = vld [vmem:[%s2359_s2 + $0x18] ss:$0 sm:$0xff]  ;;  %v1033_v31 = vpop.permute.xlu1 %1032 }
 0x1e7   : > { %v1005_v6 = vmul.f32 %v1604_v40, %v993_v59 }
 0x1e8   : > { %v937_v41 = vmul.f32 %v2019_v43, %v925_v50  ;;  %v938_v55 = vmul.f32 %v2019_v43, %v926_v61  ;;  %v1001_v43 = vsel %vm992_vm15, %v2141_v26, %v2139_v42  ;;  %v1047_v50 = vld [vmem:[#allocation2] sm:$0xff] }
 0x1e9   : > { %v1006_v9 = vmul.f32 %v1605_v44, %v1001_v43 }
 0x1ea   : > { %v942_v36 = vadd.f32 %v938_v55, %v901_v4 }
 0x1ec   : > { %v950_v54 = vpop.permute.xlu0 %949 }
 0x1ed   : > { %v953_v28 = vsel %vm951_vm14, %v948_v29, %v950_v54  ;;  %v961_v34 = vsel %vm951_vm14, %v950_v54, %v948_v29  ;;  %v859_v29 = vadd.f32 %v855_v51, %v818_v5 }
 0x1ee   : > { %v966_v11 = vmul.f32 %v962_v62, %v953_v28  ;;  %v967_v38 = vmul.f32 %v963_v63, %v961_v34 }
 0x1ef   : > { %v900_v3 = vadd.f32 %v896_v10, %v859_v29 }
 0x1f0   : > { %v978_v45 = vmul.f32 %v2035_v46, %v966_v11  ;;  %v979_v56 = vmul.f32 %v2035_v46, %v967_v38 }
 0x1f1   : > { %v941_v27 = vadd.f32 %v937_v41, %v900_v3 }
 0x1f2   : > { %v983_v53 = vadd.f32 %v979_v56, %v942_v36 }
 0x1f3   : > { %v982_v54 = vadd.f32 %v978_v45, %v941_v27 }
 0x1f4   : > { %v991_v15 = vpop.permute.xlu0 %990 }
 0x1f5   : > { %v994_v57 = vsel %vm992_vm15, %v989_v32, %v991_v15  ;;  %v1002_v62 = vsel %vm992_vm15, %v991_v15, %v989_v32  ;;  %v1043_v32 = vpop.permute.xlu2 %1042  ;;  %v1112_v15 = vld [vmem:[%s2325_s8] sm:$0xff] }
 0x1f6   : > { %v1007_v63 = vmul.f32 %v1604_v40, %v994_v57  ;;  %v1008_v24 = vmul.f32 %v1605_v44, %v1002_v62  ;;  %v1102_v44 = vld [vmem:[%s2327_s10] sm:$0xff]  ;;  %1115 = vperm.xlu2 %1595, %v1112_v15  }
 0x1f8   : > { %v1019_v35 = vmul.f32 %v1015_v49, %v1007_v63  ;;  %v1020_v48 = vmul.f32 %v1015_v49, %v1008_v24 }
 0x1fa   : > { %v1023_v60 = vadd.f32 %v1019_v35, %v982_v54  ;;  %v1024_v46 = vadd.f32 %v1020_v48, %v983_v53 }
 0x1fc   : > { %v1011_v37 = vpop.permute.xlu0 %1010  ;;  %v1037_v42 = vadd.f32 %v1033_v31, %v1023_v60  ;;  %v1038_v26 = vadd.f32 %v1033_v31, %v1024_v46 }
 0x1fd   : > { %v1017_v30 = vmul.f32 %v1011_v37, %v1005_v6  ;;  %v1018_v33 = vmul.f32 %v1011_v37, %v1006_v9 }
 0x1fe   : > { %1597 = vset.pattern.permute.xlu2 %v1721_v58 }
 0x1ff   : > { %v1021_v47 = vadd.f32 %v1017_v30, %v2135_v16  ;;  %v1022_v22 = vadd.f32 %v1018_v33, %v2137_v20  ;;  %v1736_v20 = vmov 256.0   ;;  %1226 = vperm.xlu2 %1597, %v1879_v1  }
 0x200   : > { %1612 = vrcp.f32 %v1736_v20  ;;  %v1239_v20 = vld [vmem:[%s2329_s12] sm:$0xff] }
 0x201   : > { %v1035_v23 = vadd.f32 %v1028_v25, %v1021_v47  ;;  %v1036_v52 = vadd.f32 %v1028_v25, %v1022_v22 }
 0x203   : > { %v1039_v51 = vmul.f32 %v1037_v42, %v1035_v23  ;;  %v1040_v39 = vmul.f32 %v1038_v26, %v1036_v52 }
 0x205   : > { %v1045_v28 = vmul.f32 %v1043_v32, %v1039_v51  ;;  %v1046_v34 = vmul.f32 %v1043_v32, %v1040_v39 }
 0x206   : > { %v1613_v12 = vpop.eup %1612 }
 0x207   : > { %1066 = vmatpush.msra.mxu2 %v1045_v28  ;;  %1086 = vmatpush.msra.mxu3 %v1046_v34  ;;  %v1095_v10 = vmul.f32 256.0, %v1613_v12  ;;  %vm1099_vm0 = vweird.f32 %v1613_v12 }
 0x208   : > { %1485 = vmatmul.msk.f32.vlgmr.msra.gmra.mxu2 %vm626_vm7, %v1047_v50  ;;  %1486 = vmatmul.msk.f32.vlgmr.msra.gmra.mxu3 %vm626_vm7, %v1047_v50 }
 0x209   : > { %v1096_v13 = vsub.f32 1.0, %v1095_v10  ;;  %1599 = vset.pattern.permute.xlu2 %v1718_v0 }
 0x20a   : > { %1243 = vperm.xlu2 %1599, %v1239_v20  }
 0x20b   : > { %v1097_v11 = vmul.f32 %v1613_v12, %v1096_v13 }
 0x20d   : > { %v1098_v38 = vadd.f32 %v1613_v12, %v1097_v11 }
 0x20f   : > { %v1100_v40 = vsel %vm1099_vm0, %v1613_v12, %v1098_v38 }
 0x212   : > { %1601 = vset.pattern.permute.xlu2 %v1725_v18 }
 0x250   : > { %v1116_v57 = vpop.permute.xlu2 %1115 }
 0x28b   : > { %v1068_v61 = vpop.f32.mrf.mxu2  ;;  %v1088_v16 = vpop.f32.mrf.mxu3 }
 0x28c   : > { %v1091_v5 = vadd.f32 %v1088_v16, %v1068_v61 }
 0x28e   : > { %1092 = vadd.xlane.f32.xlu0 %v1091_v5  ;;  %v1240_v5 = vld [vmem:[%s2329_s12 + $0x8] sm:$0xff] }
 0x301   : > { %v1093_v29 = vpop.xlane.xlu0 %1092 }
 0x302   : > { %v1101_v14 = vmul.f32 %v1100_v40, %v1093_v29 }
 0x304   : > { %v1103_v49 = vadd.f32 %v1102_v44, %v1101_v14  ;;  %v1618_v14 = vld [vmem:[%s1876_s23] sm:$0xff]  ;;  %s1477_s23 = sshll.u32 %s513_s26, 4 }
 0x305   : > { %1306 = vperm.xlu2 %1601, %v1618_v14   ;;  %s515_s25 = scalar_lea.vmem [#allocation5], %s1477_s23 }
 0x306   : > { %1106 = vperm.xlu1 %1593, %v1103_v49   ;;  %s1385_s16 = sshll.u32 %s515_s25, 4  ;;  %s1386_s16 = int_to_ptr.vmem [resolvable:$true] %s1385_s16 }
 0x30d   : > { %1602 = vset.pattern.permute.xlu2 %v1726_v19 }
 0x30e   : > { %1596 = vset.pattern.permute.xlu1 %v1723_v2  ;;  %1362 = vperm.xlu2 %1602, %v1618_v14  }
 0x30f   : > { %1162 = vperm.xlu1 %1596, %v1879_v1  }
 0x317   : > { %1598 = vset.pattern.permute.xlu1 %v1724_v17  ;;  %v1111_v17 = vld [vmem:[%s2324_s7] sm:$0xff] }
 0x318   : > { %1232 = vperm.xlu1 %1598, %v1879_v1  }
 0x320   : > { %1600 = vset.pattern.permute.xlu1 %v1718_v0 }
 0x321   : > { %1248 = vperm.xlu1 %1600, %v1240_v5  }
 0x378   : > { %v1107_v2 = vpop.permute.xlu1 %1106 }
 0x379   : > { %v1109_v41 = vmul.f32 %v1107_v2, %v1045_v28  ;;  %v1110_v55 = vmul.f32 %v1107_v2, %v1046_v34 }
 0x37b   : > { %1136 = vmatpush.msrb.mxu2 %v1109_v41  ;;  %1156 = vmatpush.msrb.mxu3 %v1110_v55  ;;  %v1227_v55 = vpop.permute.xlu2 %1226 }
 0x37c   : > { %1487 = vmatmul.msk.f32.vlgmr.msrb.gmra.mxu2 %vm626_vm7, %v1111_v17  ;;  %1488 = vmatmul.msk.f32.vlgmr.msrb.gmra.mxu3 %vm626_vm7, %v1111_v17 }
 0x381   : > { %v1163_v62 = vpop.permute.xlu1 %1162 }
 0x3ff   : > { %v1138_v58 = vpop.f32.mrf.mxu2  ;;  %v1158_v63 = vpop.f32.mrf.mxu3 }
 0x400   : > { %v1139_v1 = vadd.f32 %v1138_v58, %v1116_v57  ;;  %v1159_v24 = vadd.f32 %v1158_v63, %v1116_v57  ;;  %v1233_v63 = vpop.permute.xlu1 %1232 }
 0x402   : > { %v1165_v0 = vmul.f32 %v1163_v62, %v1139_v1  ;;  %v1166_v3 = vmul.f32 %v1163_v62, %v1159_v24 }
 0x404   : > { %v2241_v4 = vadd.f32 %v1165_v0, %v1888_v7  ;;  %v2244_v45 = vadd.f32 %v1166_v3, %v1890_v8  ;;  %v1237_v0 = vld [vmem:[%s2328_s11] sm:$0xff] }
 0x406   : > { %v1169_v56 = vrot.slane %v2241_v4, 4  ;;  %v1175_v59 = vrot.slane %v2244_v45, 4 }
 0x408   : > { %v1170_v43 = vadd.f32 %v1169_v56, %v2241_v4  ;;  %v1176_v25 = vadd.f32 %v1175_v59, %v2244_v45  ;;  %v1238_v56 = vld [vmem:[%s2328_s11 + $0x8] sm:$0xff] }
 0x40a   : > { %v1171_v27 = vrot.slane %v1170_v43, 2  ;;  %v1177_v36 = vrot.slane %v1176_v25, 2 }
 0x40c   : > { %v1172_v35 = vadd.f32 %v1171_v27, %v1170_v43  ;;  %v1178_v48 = vadd.f32 %v1177_v36, %v1176_v25  ;;  %v1244_v43 = vpop.permute.xlu2 %1243  ;;  %v1249_v27 = vpop.permute.xlu1 %1248 }
 0x40e   : > { %v1173_v6 = vrot.slane %v1172_v35, 1  ;;  %v1179_v9 = vrot.slane %v1178_v48, 1 }
 0x410   : > { %v1174_v54 = vadd.f32 %v1173_v6, %v1172_v35  ;;  %v1180_v7 = vadd.f32 %v1179_v9, %v1178_v48 }
 0x412   : > { %v1181_v53 = vmul.f32 %v1174_v54, %v1896_v21  ;;  %v1182_v8 = vmul.f32 %v1180_v7, %v1896_v21 }
 0x414   : > { %v1183_v37 = vsub.f32 %v2241_v4, %v1181_v53  ;;  %v1184_v60 = vsub.f32 %v2244_v45, %v1182_v8  ;;  %v1307_v54 = vpop.permute.xlu2 %1306 }
 0x416   : > { %v1185_v46 = vmul.f32 %v1183_v37, %v1183_v37  ;;  %v1186_v30 = vmul.f32 %v1184_v60, %v1184_v60 }
 0x418   : > { %v1187_v33 = vrot.slane %v1185_v46, 4  ;;  %v1193_v31 = vrot.slane %v1186_v30, 4 }
 0x41a   : > { %v1188_v47 = vadd.f32 %v1187_v33, %v1185_v46  ;;  %v1194_v22 = vadd.f32 %v1193_v31, %v1186_v30 }
 0x41c   : > { %v1189_v42 = vrot.slane %v1188_v47, 2  ;;  %v1195_v26 = vrot.slane %v1194_v22, 2  ;;  %v1363_v33 = vpop.permute.xlu2 %1362 }
 0x41e   : > { %v1190_v23 = vadd.f32 %v1189_v42, %v1188_v47  ;;  %v1196_v52 = vadd.f32 %v1195_v26, %v1194_v22 }
 0x420   : > { %v1191_v32 = vrot.slane %v1190_v23, 1  ;;  %v1197_v51 = vrot.slane %v1196_v52, 1 }
 0x422   : > { %v1192_v39 = vadd.f32 %v1191_v32, %v1190_v23  ;;  %v1198_v28 = vadd.f32 %v1197_v51, %v1196_v52 }
 0x424   : > { %v1199_v34 = vmul.f32 %v1192_v39, %v1896_v21  ;;  %v1200_v50 = vmul.f32 %v1198_v28, %v1896_v21  ;;  %v1312_v21 = vld [vmem:[%s2331_s14] sm:$0xff] }
 0x425   : > { %1315 = vperm.xlu1 %1600, %v1312_v21  }
 0x426   : > { %v1201_v61 = vadd.f32 1e-06, %v1199_v34  ;;  %v1202_v16 = vadd.f32 1e-06, %v1200_v50 }
 0x428   : > { %1614 = vrsqrt.f32 %v1201_v61  ;;  %vm1209_vm3 = vweird.f32 %v1201_v61  ;;  %vm1219_vm5 = vweird.f32 %v1202_v16 }
 0x429   : > { %1616 = vrsqrt.f32 %v1202_v16 }
 0x42e   : > { %v1615_v12 = vpop.eup %1614 }
 0x42f   : > { %v1617_v10 = vpop.eup %1616  ;;  %v1204_v13 = vmul.f32 %v1615_v12, %v1201_v61  ;;  %vm1210_vm1 = vweird.f32 %v1615_v12 }
 0x430   : > { %v1214_v11 = vmul.f32 %v1617_v10, %v1202_v16  ;;  %vm1220_vm2 = vweird.f32 %v1617_v10  ;;  %vm1211_vm4 = vmor %vm1209_vm3, %vm1210_vm1 }
 0x431   : > { %v1205_v38 = vmul.f32 %v1615_v12, %v1204_v13  ;;  %vm1221_vm6 = vmor %vm1219_vm5, %vm1220_vm2 }
 0x432   : > { %v1215_v40 = vmul.f32 %v1617_v10, %v1214_v11 }
 0x433   : > { %v1206_v44 = vmul.f32 0.5, %v1205_v38 }
 0x434   : > { %v1216_v29 = vmul.f32 0.5, %v1215_v40 }
 0x435   : > { %v1207_v49 = vsub.f32 1.5, %v1206_v44 }
 0x436   : > { %v1217_v15 = vsub.f32 1.5, %v1216_v29 }
 0x437   : > { %v1208_v2 = vmul.f32 %v1615_v12, %v1207_v49 }
 0x438   : > { %v1218_v41 = vmul.f32 %v1617_v10, %v1217_v15 }
 0x439   : > { %v1212_v17 = vsel %vm1211_vm4, %v1615_v12, %v1208_v2 }
 0x43a   : > { %v1222_v57 = vsel %vm1221_vm6, %v1617_v10, %v1218_v41  ;;  %v1223_v62 = vmul.f32 %v1212_v17, %v1183_v37  ;;  %v1311_v37 = vld [vmem:[%s2330_s13] sm:$0xff] }
 0x43b   : > { %v1224_v58 = vmul.f32 %v1222_v57, %v1184_v60 }
 0x43c   : > { %v1229_v18 = vmul.f32 %v1227_v55, %v1223_v62 }
 0x43d   : > { %v1230_v1 = vmul.f32 %v1227_v55, %v1224_v58 }
 0x43e   : > { %v1235_v24 = vadd.f32 %v1233_v63, %v1229_v18 }
 0x43f   : > { %v1236_v3 = vadd.f32 %v1233_v63, %v1230_v1 }
 0x440   : > { %1272 = vmatpush.msrb.mxu0 %v1235_v24 }
 0x441   : > { %1295 = vmatpush.msrb.mxu1 %v1236_v3  ;;  %1489 = vmatmul.msk.f32.vlgmr.msrb.gmra.mxu0 %vm626_vm7, %v1237_v0 }
 0x442   : > { %1491 = vmatmul.msk.f32.vlgmr.msrb.gmra.mxu1 %vm626_vm7, %v1237_v0 }
 0x449   : > { %1490 = vmatmul.msk.f32.gmra.mxu0 %vm626_vm7, %v1238_v56 }
 0x44a   : > { %1492 = vmatmul.msk.f32.gmra.mxu1 %vm626_vm7, %v1238_v56 }
 0x497   : > { %v1316_v46 = vpop.permute.xlu1 %1315 }
 0x4be   : > { %v1274_v19 = vpop.f32.mrf.mxu0 }
 0x4bf   : > { %v1297_v59 = vpop.f32.mrf.mxu1  ;;  %v1275_v36 = vadd.f32 %v1274_v19, %v1244_v43 }
 0x4c0   : > { %v1298_v6 = vadd.f32 %v1297_v59, %v1244_v43 }
 0x4c6   : > { %v1277_v25 = vpop.f32.mrf.mxu0 }
 0x4c7   : > { %v1300_v35 = vpop.f32.mrf.mxu1  ;;  %v1278_v48 = vadd.f32 %v1277_v25, %v1249_v27 }
 0x4c8   : > { %v1301_v9 = vadd.f32 %v1300_v35, %v1249_v27 }
 0x4c9   : > { %v1303_v7 = vmul.f32 %v1278_v48, %v1275_v36 }
 0x4ca   : > { %v1304_v53 = vmul.f32 %v1301_v9, %v1298_v6 }
 0x4cb   : > { %v1309_v8 = vmul.f32 %v1307_v54, %v1303_v7 }
 0x4cc   : > { %v1310_v60 = vmul.f32 %v1307_v54, %v1304_v53 }
 0x4cd   : > { %1336 = vmatpush.msra.mxu2 %v1309_v8 }
 0x4ce   : > { %1356 = vmatpush.msra.mxu3 %v1310_v60  ;;  %1493 = vmatmul.msk.f32.vlgmr.msra.gmra.mxu2 %vm626_vm7, %v1311_v37 }
 0x4cf   : > { %1494 = vmatmul.msk.f32.vlgmr.msra.gmra.mxu3 %vm626_vm7, %v1311_v37 }
 0x551   : > { %v1338_v30 = vpop.f32.mrf.mxu2 }
 0x552   : > { %v1339_v31 = vadd.f32 %v1338_v30, %v1316_v46  ;;  %v1358_v47 = vpop.f32.mrf.mxu3 }
 0x553   : > { %v1359_v22 = vadd.f32 %v1358_v47, %v1316_v46 }
 0x554   : > { %v1365_v42 = vmul.f32 %v1363_v33, %v1339_v31 }
 0x555   : > { %v1366_v26 = vmul.f32 %v1363_v33, %v1359_v22 }
 0x556   : > { %v1367_v23 = vadd.f32 %v1365_v42, %v2241_v4 }
 0x557   : > { %v1368_v52 = vadd.f32 %v1366_v26, %v2244_v45 }
 0x558   : > { %1369 = vst [vmem:[%s515_s25] sm:$0xff] %v1367_v23 }
 0x559   : > { %1370 = vst [vmem:[%s515_s25 + $0x8] sm:$0xff] %v1368_v52 }
 0x55a   : > { %1676 = shalt.err (!%p1673_p8)
}
 0x55b   : > { %1506 = dma.vmem_to_hbm [thread:$0]  (%p1855_p5), %s1386_s16, 256, %s1388_s1, %s1372_s22  }
 0x55c PF: > { %p1518_p9 = scmp.ge.s32.totalorder %s1715_s21, 2  ;;  %s1399_s26 = sand.u32 1, %s1703_s18  }
 0x55d   : > { %s1400_s25 = scalar_lea.sflag [#allocation4], %s1399_s26 }
 0x55e   : > { %p1513_p10 = pnand %p1518_p9, %p1859_p6 }
 0x560   : > { %p1514_p11 = pneg %p1513_p10 }
 0x562   : > { %1698 = dma.done.wait (%p1514_p11), %s1400_s25, 256  }
 0x563   : > { %1700 = vsyncadd (%p1514_p11), %s1400_s25, 4294967040  ;;  %p26_p12 = scmp.ge.s32.totalorder %s1842_s24, 4   ;;  %s2360_s18 = smov %s1707_s19 }
 0x564   : > { %s2361_s19 = smov %s1711_s20  ;;  %s2362_s20 = smov %s1853_s27 }
 0x565   : > { %s2363_s21 = smov %s1842_s24  ;;  %28 = sbr.rel (!%p26_p12) target bundleno = 10 (0xa), region = 123 }
 0x56a   :  { %1406 = vsyncpa [#allocation3], 1 }
 0x56b   :  { %1408 = vsyncpa [#allocation3 + $0x1], 1 }
 0x56c   :  { %1409 = vsyncpa [#allocation4], 1 }
 0x56d   :  { %1411 = vsyncpa [#allocation4 + $0x1], 1 }

</bundles_post_ra>
